<compile_context>
chip_gen: v7x
topology: tpu7x:2x2x1
jax: 0.10.0
libtpu: 0.0.40
codegen_flags: <defaults>
</compile_context>

<pallas_src>
import math

import jax
import jax.numpy as jnp
from jax.experimental import pallas as pl
from jax.experimental.pallas import tpu as pltpu

# ---- model config (matches the module's Config fields) ----
D_MODEL = 32           # config.classifier.transformer_dim
N_HEADS = 4            # config.classifier.transformer_heads
HEAD_DIM = D_MODEL // N_HEADS
D_FF = 4 * D_MODEL     # dim_feedforward
N_LAYERS = 2           # config.classifier.transformer_layers
MAX_LEN = 8            # config.classifier.max_text_length
LN_EPS = 1e-5          # PyTorch layer_norm_eps default


def _layer_norm(x, gamma, beta):
    """Biased-variance LayerNorm over the last axis (matches nn.LayerNorm)."""
    mu = jnp.mean(x, axis=-1, keepdims=True)
    var = jnp.mean((x - mu) ** 2, axis=-1, keepdims=True)
    return (x - mu) * jax.lax.rsqrt(var + LN_EPS) * gamma + beta


# ----------------------------- fused Pallas kernel ---------------------------

def _encoder_kernel(x_ref, pos_ref, hmask_ref, bmask_ref,
                    wqkv_ref, bqkv_ref, wo_ref, bo_ref,
                    ln1g_ref, ln1b_ref, w1_ref, b1_ref,
                    w2_ref, b2_ref, ln2g_ref, ln2b_ref,
                    o_ref):
    """Fused: pos-add + N_LAYERS post-norm transformer encoder layers.

    x_ref    : (M, D)        activations, batch collapsed into M = B*S
    pos_ref  : (M, D)        positional encoding pre-tiled over batch
    hmask_ref: (H, 1, D)     0/1 lane mask selecting each head's feature block
    bmask_ref: (M, M)        additive mask: 0 within a batch row-block, -1e30 across
    wqkv_ref : (L, D, 3D)    in_proj_weight.T          bqkv: (L, 1, 3D)
    wo_ref   : (L, D, D)     out_proj_weight.T         bo  : (L, 1, D)
    w1       : (L, D, D_FF)  linear1_weight.T          b1  : (L, 1, D_FF)
    w2       : (L, D_FF, D)  linear2_weight.T          b2  : (L, 1, D)
    ln*g/ln*b: (L, 1, D)
    """
    M, D = x_ref.shape
    L = wqkv_ref.shape[0]
    H = hmask_ref.shape[0]
    HD = D // H
    scale = 1.0 / math.sqrt(HD)

    h = x_ref[...] + pos_ref[...]            # (M, D)
    hmask = hmask_ref[...]                   # (H, 1, D) -- loaded once, hoisted
    bmask = bmask_ref[...]                   # (M, M)

    for l in range(L):                       # static unrolled, L == 2
        # ---- QKV projection: one (M, D) @ (D, 3D) matmul ----
        qkv = jnp.dot(h, wqkv_ref[l],
                      preferred_element_type=jnp.float32) + bqkv_ref[l]   # (M, 3D)
        q = qkv[:, 0:D]
        k = qkv[:, D:2 * D]
        v = qkv[:, 2 * D:3 * D]

        # ---- scaled dot-product attention, batched over heads (and batch) ----
        # Head-masked Q: each head's lanes outside its feature block are zero,
        # so contracting over the full D gives exactly Q_h @ K_h^T per head.
        qm = q[None, :, :] * hmask                       # (H, M, D)
        kb = jnp.broadcast_to(k, (H, M, D))
        vb = jnp.broadcast_to(v, (H, M, D))

        s = jnp.einsum('hmd,hnd->hmn', qm, kb,
                       preferred_element_type=jnp.float32) * scale        # (H, M, M)
        s = s + bmask                                    # kill cross-batch logits
        s = s - jnp.max(s, axis=-1, keepdims=True)
        p = jnp.exp(s)
        p = p * pl.reciprocal(jnp.sum(p, axis=-1, keepdims=True), approx=True)
        ctx = jnp.einsum('hmn,hnd->hmd', p, vb,
                         preferred_element_type=jnp.float32)              # (H, M, D)

        # Merge heads back into lanes (select head-own columns, sum over H),
        # then one (M, D) @ (D, D) output projection.
        merged = jnp.sum(ctx * hmask, axis=0)                             # (M, D)
        attn = jnp.dot(merged, wo_ref[l],
                       preferred_element_type=jnp.float32) + bo_ref[l]

        # ---- residual + LayerNorm 1 (post-norm, PyTorch norm_first=False) ----
        y = _layer_norm(h + attn, ln1g_ref[l], ln1b_ref[l])

        # ---- feed-forward (ReLU) ----
        f = jnp.dot(y, w1_ref[l], preferred_element_type=jnp.float32) + b1_ref[l]
        f = jnp.maximum(f, 0.0)
        f = jnp.dot(f, w2_ref[l], preferred_element_type=jnp.float32) + b2_ref[l]

        # ---- residual + LayerNorm 2 ----
        h = _layer_norm(y + f, ln2g_ref[l], ln2b_ref[l])

    o_ref[...] = h.astype(o_ref.dtype)


# ------------------------------- wrapper --------------------------------------

def _full_spec(shape):
    """Full-array VMEM block (block == array dims satisfies the (8,128) rule)."""
    zeros = (0,) * len(shape)
    return pl.BlockSpec(tuple(shape), lambda i: zeros)


@jax.jit
def transformer_encoder(x, pos_encoding, params):
    """x: (B, S, D) float32, batch_first.  Returns (B, S, D)."""
    B, S, D = x.shape
    M = B * S
    x2 = x.reshape(M, D)                          # collapse batch into matmul M dim
    pos2 = jnp.tile(pos_encoding[0, :S, :], (B, 1))            # (M, D), pre-tiled

    # Static masks (constant-folded under jit; plain layout plumbing).
    d_idx = jnp.arange(D, dtype=jnp.int32)
    head_mask = (d_idx[None, :] // HEAD_DIM ==
                 jnp.arange(N_HEADS, dtype=jnp.int32)[:, None]
                 ).astype(jnp.float32)[:, None, :]             # (H, 1, D)
    m_idx = jnp.arange(M, dtype=jnp.int32)
    same_batch = (m_idx[:, None] // S) == (m_idx[None, :] // S)
    batch_mask = jnp.where(same_batch, 0.0, -1e30).astype(jnp.float32)   # (M, M)

    args = (x2, pos2, head_mask, batch_mask,
            params["wqkv"], params["bqkv"], params["wo"], params["bo"],
            params["ln1_g"], params["ln1_b"], params["w1"], params["b1"],
            params["w2"], params["b2"], params["ln2_g"], params["ln2_b"])

    out = pl.pallas_call(
        _encoder_kernel,
        out_shape=jax.ShapeDtypeStruct((M, D), jnp.float32),
        grid=(1,),                                   # single fused step
        in_specs=[_full_spec(a.shape) for a in args],
        out_specs=_full_spec((M, D)),
        compiler_params=pltpu.CompilerParams(
            dimension_semantics=("arbitrary",),
            vmem_limit_bytes=8 * 1024 * 1024),
    )(*args)
    return out.reshape(B, S, D)


# ------------------- parameters: PyTorch layout + kernel packing --------------

def init_torch_params(key):
    """Deterministic random params in native nn.TransformerEncoderLayer layout."""
    keys = jax.random.split(key, 1 + N_LAYERS)
    pos_encoding = jax.random.normal(keys[0], (1, MAX_LEN, D_MODEL), jnp.float32)

    layers = []
    for i in range(N_LAYERS):
        k = jax.random.split(keys[1 + i], 12)
        s_in = 1.0 / math.sqrt(D_MODEL)
        s_ff = 1.0 / math.sqrt(D_FF)
        layers.append(dict(
            in_proj_weight=s_in * jax.random.normal(k[0], (3 * D_MODEL, D_MODEL), jnp.float32),
            in_proj_bias=0.1 * jax.random.normal(k[1], (3 * D_MODEL,), jnp.float32),
            out_proj_weight=s_in * jax.random.normal(k[2], (D_MODEL, D_MODEL), jnp.float32),
            out_proj_bias=0.1 * jax.random.normal(k[3], (D_MODEL,), jnp.float32),
            linear1_weight=s_in * jax.random.normal(k[4], (D_FF, D_MODEL), jnp.float32),
            linear1_bias=0.1 * jax.random.normal(k[5], (D_FF,), jnp.float32),
            linear2_weight=s_ff * jax.random.normal(k[6], (D_MODEL, D_FF), jnp.float32),
            linear2_bias=0.1 * jax.random.normal(k[7], (D_MODEL,), jnp.float32),
            norm1_weight=1.0 + 0.1 * jax.random.normal(k[8], (D_MODEL,), jnp.float32),
            norm1_bias=0.1 * jax.random.normal(k[9], (D_MODEL,), jnp.float32),
            norm2_weight=1.0 + 0.1 * jax.random.normal(k[10], (D_MODEL,), jnp.float32),
            norm2_bias=0.1 * jax.random.normal(k[11], (D_MODEL,), jnp.float32),
        ))
    return pos_encoding, layers


def pack_params(torch_layers):
    """PyTorch layout -> fused-kernel layout (matmul weights transposed to (in, out))."""
    D, FF = D_MODEL, D_FF

    def stack(fn):
        return jnp.stack([fn(p) for p in torch_layers], axis=0)

    return dict(
        wqkv=stack(lambda p: p["in_proj_weight"].T),                # (L, D, 3D)
        bqkv=stack(lambda p: p["in_proj_bias"].reshape(1, 3 * D)),  # (L, 1, 3D)
        wo=stack(lambda p: p["out_proj_weight"].T),                 # (L, D, D)
        bo=stack(lambda p: p["out_proj_bias"].reshape(1, D)),
        ln1_g=stack(lambda p: p["norm1_weight"].reshape(1, D)),
        ln1_b=stack(lambda p: p["norm1_bias"].reshape(1, D)),
        w1=stack(lambda p: p["linear1_weight"].T),                  # (L, D, D_FF)
        b1=stack(lambda p: p["linear1_bias"].reshape(1, FF)),
        w2=stack(lambda p: p["linear2_weight"].T),                  # (L, D_FF, D)
        b2=stack(lambda p: p["linear2_bias"].reshape(1, D)),
        ln2_g=stack(lambda p: p["norm2_weight"].reshape(1, D)),
        ln2_b=stack(lambda p: p["norm2_bias"].reshape(1, D)),
    )


# ------------------------- pure-JAX reference (for parity) --------------------

def reference_encoder(x, pos_encoding, torch_layers):
    B, S, D = x.shape
    H, HD = N_HEADS, HEAD_DIM
    hp = jax.lax.Precision.HIGHEST
    h = x + pos_encoding[:, :S]
    for p in torch_layers:
        qkv = jnp.einsum('bsd,ed->bse', h, p["in_proj_weight"], precision=hp) + p["in_proj_bias"]
        q, k, v = jnp.split(qkv, 3, axis=-1)
        split = lambda t: t.reshape(B, S, H, HD).transpose(0, 2, 1, 3)
        q, k, v = split(q), split(k), split(v)
        s = jnp.einsum('bhqd,bhkd->bhqk', q, k, precision=hp) / math.sqrt(HD)
        pr = jax.nn.softmax(s, axis=-1)
        ctx = jnp.einsum('bhqk,bhkd->bhqd', pr, v, precision=hp)
        ctx = ctx.transpose(0, 2, 1, 3).reshape(B, S, D)
        attn = jnp.einsum('bsd,od->bso', ctx, p["out_proj_weight"], precision=hp) + p["out_proj_bias"]
        y = _layer_norm(h + attn, p["norm1_weight"], p["norm1_bias"])
        f = jnp.einsum('bsd,fd->bsf', y, p["linear1_weight"], precision=hp) + p["linear1_bias"]
        f = jnp.maximum(f, 0.0)
        f = jnp.einsum('bsf,df->bsd', f, p["linear2_weight"], precision=hp) + p["linear2_bias"]
        h = _layer_norm(y + f, p["norm2_weight"], p["norm2_bias"])
    return h


# ----------------------------------- main --------------------------------------

if __name__ == "__main__":
    key = jax.random.PRNGKey(0)
    k_param, k_x = jax.random.split(key)
    pos_encoding, torch_layers = init_torch_params(k_param)
    packed = pack_params(torch_layers)

    B, S = 2, MAX_LEN
    x = jax.random.normal(k_x, (B, S, D_MODEL), jnp.float32)

    out = transformer_encoder(x, pos_encoding, packed)
    out = jax.block_until_ready(out)

    assert out.shape == (B, S, D_MODEL), out.shape
    assert bool(jnp.all(jnp.isfinite(out)))

    ref = reference_encoder(x, pos_encoding, torch_layers)
    assert bool(jnp.allclose(out, ref, atol=5e-2, rtol=5e-2)), \
        float(jnp.max(jnp.abs(out - ref)))

    print("KERNEL_OK")
</pallas_src>

<mosaic_0001>
module attributes {stable_mosaic.version = 11 : i64} {
  func.func @_encoder_kernel(%arg0: i32, %arg1: memref<16x32xf32, #tpu.memory_space<vmem>>, %arg2: memref<16x32xf32, #tpu.memory_space<vmem>>, %arg3: memref<4x1x32xf32, #tpu.memory_space<vmem>>, %arg4: memref<16x16xf32, #tpu.memory_space<vmem>>, %arg5: memref<2x32x96xf32, #tpu.memory_space<vmem>>, %arg6: memref<2x1x96xf32, #tpu.memory_space<vmem>>, %arg7: memref<2x32x32xf32, #tpu.memory_space<vmem>>, %arg8: memref<2x1x32xf32, #tpu.memory_space<vmem>>, %arg9: memref<2x1x32xf32, #tpu.memory_space<vmem>>, %arg10: memref<2x1x32xf32, #tpu.memory_space<vmem>>, %arg11: memref<2x32x128xf32, #tpu.memory_space<vmem>>, %arg12: memref<2x1x128xf32, #tpu.memory_space<vmem>>, %arg13: memref<2x128x32xf32, #tpu.memory_space<vmem>>, %arg14: memref<2x1x32xf32, #tpu.memory_space<vmem>>, %arg15: memref<2x1x32xf32, #tpu.memory_space<vmem>>, %arg16: memref<2x1x32xf32, #tpu.memory_space<vmem>>, %arg17: memref<16x32xf32, #tpu.memory_space<vmem>>) attributes {dimension_semantics = [#tpu.dimension_semantics<arbitrary>], iteration_bounds = array<i64: 1>, scalar_prefetch = 0 : i64, scratch_operands = 0 : i64, tpu.core_type = #tpu.core_type<tc>, window_params = [{pipeline_mode = #tpu.pipeline_mode<synchronous>, transform_indices = @transform_0, window_bounds = array<i64: 16, 32>}, {pipeline_mode = #tpu.pipeline_mode<synchronous>, transform_indices = @transform_1, window_bounds = array<i64: 16, 32>}, {pipeline_mode = #tpu.pipeline_mode<synchronous>, transform_indices = @transform_2, window_bounds = array<i64: 4, 1, 32>}, {pipeline_mode = #tpu.pipeline_mode<synchronous>, transform_indices = @transform_3, window_bounds = array<i64: 16, 16>}, {pipeline_mode = #tpu.pipeline_mode<synchronous>, transform_indices = @transform_4, window_bounds = array<i64: 2, 32, 96>}, {pipeline_mode = #tpu.pipeline_mode<synchronous>, transform_indices = @transform_5, window_bounds = array<i64: 2, 1, 96>}, {pipeline_mode = #tpu.pipeline_mode<synchronous>, transform_indices = @transform_6, window_bounds = array<i64: 2, 32, 32>}, {pipeline_mode = #tpu.pipeline_mode<synchronous>, transform_indices = @transform_7, window_bounds = array<i64: 2, 1, 32>}, {pipeline_mode = #tpu.pipeline_mode<synchronous>, transform_indices = @transform_8, window_bounds = array<i64: 2, 1, 32>}, {pipeline_mode = #tpu.pipeline_mode<synchronous>, transform_indices = @transform_9, window_bounds = array<i64: 2, 1, 32>}, {pipeline_mode = #tpu.pipeline_mode<synchronous>, transform_indices = @transform_10, window_bounds = array<i64: 2, 32, 128>}, {pipeline_mode = #tpu.pipeline_mode<synchronous>, transform_indices = @transform_11, window_bounds = array<i64: 2, 1, 128>}, {pipeline_mode = #tpu.pipeline_mode<synchronous>, transform_indices = @transform_12, window_bounds = array<i64: 2, 128, 32>}, {pipeline_mode = #tpu.pipeline_mode<synchronous>, transform_indices = @transform_13, window_bounds = array<i64: 2, 1, 32>}, {pipeline_mode = #tpu.pipeline_mode<synchronous>, transform_indices = @transform_14, window_bounds = array<i64: 2, 1, 32>}, {pipeline_mode = #tpu.pipeline_mode<synchronous>, transform_indices = @transform_15, window_bounds = array<i64: 2, 1, 32>}, {pipeline_mode = #tpu.pipeline_mode<synchronous>, transform_indices = @transform_16, window_bounds = array<i64: 16, 32>}]} {
    %c0 = arith.constant 0 : index
    %c0_0 = arith.constant 0 : index
    %0 = vector.load %arg1[%c0, %c0_0] : memref<16x32xf32, #tpu.memory_space<vmem>>, vector<16x32xf32>
    %c0_1 = arith.constant 0 : index
    %c0_2 = arith.constant 0 : index
    %1 = vector.load %arg2[%c0_1, %c0_2] : memref<16x32xf32, #tpu.memory_space<vmem>>, vector<16x32xf32>
    %2 = arith.addf %0, %1 : vector<16x32xf32>
    %c0_3 = arith.constant 0 : index
    %c0_4 = arith.constant 0 : index
    %c0_5 = arith.constant 0 : index
    %3 = vector.load %arg3[%c0_3, %c0_4, %c0_5] : memref<4x1x32xf32, #tpu.memory_space<vmem>>, vector<4x1x32xf32>
    %c0_6 = arith.constant 0 : index
    %c0_7 = arith.constant 0 : index
    %4 = vector.load %arg4[%c0_6, %c0_7] : memref<16x16xf32, #tpu.memory_space<vmem>>, vector<16x16xf32>
    %c0_8 = arith.constant 0 : index
    %c0_9 = arith.constant 0 : index
    %c0_10 = arith.constant 0 : index
    %5 = vector.load %arg5[%c0_8, %c0_9, %c0_10] : memref<2x32x96xf32, #tpu.memory_space<vmem>>, vector<1x32x96xf32>
    %6 = vector.shape_cast %5 : vector<1x32x96xf32> to vector<32x96xf32>
    %cst = arith.constant dense<0.000000e+00> : vector<16x96xf32>
    %7 = tpu.matmul %2, %6, %cst {dimension_numbers = #tpu.dot_dimension_numbers<[1], [0], [0], [1], [0, 0, 1, 1], [], []>} : vector<16x32xf32>, vector<32x96xf32>, vector<16x96xf32> -> vector<16x96xf32>
    %c0_11 = arith.constant 0 : index
    %c0_12 = arith.constant 0 : index
    %c0_13 = arith.constant 0 : index
    %8 = vector.load %arg6[%c0_11, %c0_12, %c0_13] : memref<2x1x96xf32, #tpu.memory_space<vmem>>, vector<1x1x96xf32>
    %9 = vector.shape_cast %8 : vector<1x1x96xf32> to vector<1x96xf32>
    %10 = vector.broadcast %9 : vector<1x96xf32> to vector<16x96xf32>
    %11 = arith.addf %7, %10 : vector<16x96xf32>
    %12 = vector.extract_strided_slice %11 {offsets = [0, 0], sizes = [16, 32], strides = [1, 1]} : vector<16x96xf32> to vector<16x32xf32>
    %13 = vector.extract_strided_slice %11 {offsets = [0, 32], sizes = [16, 32], strides = [1, 1]} : vector<16x96xf32> to vector<16x32xf32>
    %14 = vector.extract_strided_slice %11 {offsets = [0, 64], sizes = [16, 32], strides = [1, 1]} : vector<16x96xf32> to vector<16x32xf32>
    %15 = vector.shape_cast %12 : vector<16x32xf32> to vector<1x16x32xf32>
    %16 = vector.broadcast %15 : vector<1x16x32xf32> to vector<4x16x32xf32>
    %17 = vector.broadcast %3 : vector<4x1x32xf32> to vector<4x16x32xf32>
    %18 = arith.mulf %16, %17 : vector<4x16x32xf32>
    %19 = vector.shape_cast %13 : vector<16x32xf32> to vector<1x16x32xf32>
    %20 = vector.broadcast %19 : vector<1x16x32xf32> to vector<4x16x32xf32>
    %21 = vector.shape_cast %14 : vector<16x32xf32> to vector<1x16x32xf32>
    %22 = vector.broadcast %21 : vector<1x16x32xf32> to vector<4x16x32xf32>
    "tpu.trace_start"() <{level = 10 : i32, message = "hmd,hnd->hmn"}> : () -> ()
    %cst_14 = arith.constant dense<0.000000e+00> : vector<4x16x16xf32>
    %23 = tpu.matmul %18, %20, %cst_14 {dimension_numbers = #tpu.dot_dimension_numbers<[2], [2], [1], [1], [0, 0, 0, 1, 1, 1], [0], [0]>} : vector<4x16x32xf32>, vector<4x16x32xf32>, vector<4x16x16xf32> -> vector<4x16x16xf32>
    "tpu.trace_stop"() : () -> ()
    %cst_15 = arith.constant 0.353553385 : f32
    %24 = vector.broadcast %cst_15 : f32 to vector<4x16x16xf32>
    %25 = arith.mulf %23, %24 : vector<4x16x16xf32>
    %26 = vector.shape_cast %4 : vector<16x16xf32> to vector<1x16x16xf32>
    %27 = vector.broadcast %26 : vector<1x16x16xf32> to vector<4x16x16xf32>
    %28 = arith.addf %25, %27 : vector<4x16x16xf32>
    %cst_16 = arith.constant dense<0xFF800000> : vector<4x16xf32>
    %29 = vector.multi_reduction <maximumf>, %28, %cst_16 [2] : vector<4x16x16xf32> to vector<4x16xf32>
    %30 = vector.shape_cast %29 : vector<4x16xf32> to vector<4x16x1xf32>
    %31 = vector.broadcast %30 : vector<4x16x1xf32> to vector<4x16x16xf32>
    %32 = arith.subf %28, %31 : vector<4x16x16xf32>
    %33 = math.exp %32 : vector<4x16x16xf32>
    %cst_17 = arith.constant dense<0.000000e+00> : vector<4x16xf32>
    %34 = vector.multi_reduction <add>, %33, %cst_17 [2] : vector<4x16x16xf32> to vector<4x16xf32>
    %35 = vector.shape_cast %34 : vector<4x16xf32> to vector<4x16x1xf32>
    %36 = tpu.reciprocal %35 {approx = true} : vector<4x16x1xf32> -> vector<4x16x1xf32>
    %37 = vector.broadcast %36 : vector<4x16x1xf32> to vector<4x16x16xf32>
    %38 = arith.mulf %33, %37 : vector<4x16x16xf32>
    "tpu.trace_start"() <{level = 10 : i32, message = "hmn,hnd->hmd"}> : () -> ()
    %cst_18 = arith.constant dense<0.000000e+00> : vector<4x16x32xf32>
    %39 = tpu.matmul %38, %22, %cst_18 {dimension_numbers = #tpu.dot_dimension_numbers<[2], [1], [1], [2], [0, 0, 0, 1, 1, 2], [0], [0]>} : vector<4x16x16xf32>, vector<4x16x32xf32>, vector<4x16x32xf32> -> vector<4x16x32xf32>
    "tpu.trace_stop"() : () -> ()
    %40 = vector.broadcast %3 : vector<4x1x32xf32> to vector<4x16x32xf32>
    %41 = arith.mulf %39, %40 : vector<4x16x32xf32>
    %cst_19 = arith.constant dense<0.000000e+00> : vector<16x32xf32>
    %42 = vector.multi_reduction <add>, %41, %cst_19 [0] : vector<4x16x32xf32> to vector<16x32xf32>
    %c0_20 = arith.constant 0 : index
    %c0_21 = arith.constant 0 : index
    %c0_22 = arith.constant 0 : index
    %43 = vector.load %arg7[%c0_20, %c0_21, %c0_22] : memref<2x32x32xf32, #tpu.memory_space<vmem>>, vector<1x32x32xf32>
    %44 = vector.shape_cast %43 : vector<1x32x32xf32> to vector<32x32xf32>
    %cst_23 = arith.constant dense<0.000000e+00> : vector<16x32xf32>
    %45 = tpu.matmul %42, %44, %cst_23 {dimension_numbers = #tpu.dot_dimension_numbers<[1], [0], [0], [1], [0, 0, 1, 1], [], []>} : vector<16x32xf32>, vector<32x32xf32>, vector<16x32xf32> -> vector<16x32xf32>
    %c0_24 = arith.constant 0 : index
    %c0_25 = arith.constant 0 : index
    %c0_26 = arith.constant 0 : index
    %46 = vector.load %arg8[%c0_24, %c0_25, %c0_26] : memref<2x1x32xf32, #tpu.memory_space<vmem>>, vector<1x1x32xf32>
    %47 = vector.shape_cast %46 : vector<1x1x32xf32> to vector<1x32xf32>
    %48 = vector.broadcast %47 : vector<1x32xf32> to vector<16x32xf32>
    %49 = arith.addf %45, %48 : vector<16x32xf32>
    %50 = arith.addf %2, %49 : vector<16x32xf32>
    %c0_27 = arith.constant 0 : index
    %c0_28 = arith.constant 0 : index
    %c0_29 = arith.constant 0 : index
    %51 = vector.load %arg9[%c0_27, %c0_28, %c0_29] : memref<2x1x32xf32, #tpu.memory_space<vmem>>, vector<1x1x32xf32>
    %52 = vector.shape_cast %51 : vector<1x1x32xf32> to vector<1x32xf32>
    %c0_30 = arith.constant 0 : index
    %c0_31 = arith.constant 0 : index
    %c0_32 = arith.constant 0 : index
    %53 = vector.load %arg10[%c0_30, %c0_31, %c0_32] : memref<2x1x32xf32, #tpu.memory_space<vmem>>, vector<1x1x32xf32>
    %54 = vector.shape_cast %53 : vector<1x1x32xf32> to vector<1x32xf32>
    %cst_33 = arith.constant dense<0.000000e+00> : vector<16xf32>
    %55 = vector.multi_reduction <add>, %50, %cst_33 [1] : vector<16x32xf32> to vector<16xf32>
    %56 = vector.shape_cast %55 : vector<16xf32> to vector<16x1xf32>
    %cst_34 = arith.constant 3.200000e+01 : f32
    %57 = vector.broadcast %cst_34 : f32 to vector<16x1xf32>
    %58 = arith.divf %56, %57 : vector<16x1xf32>
    %59 = vector.broadcast %58 : vector<16x1xf32> to vector<16x32xf32>
    %60 = arith.subf %50, %59 : vector<16x32xf32>
    %61 = arith.mulf %60, %60 : vector<16x32xf32>
    %cst_35 = arith.constant dense<0.000000e+00> : vector<16xf32>
    %62 = vector.multi_reduction <add>, %61, %cst_35 [1] : vector<16x32xf32> to vector<16xf32>
    %63 = vector.shape_cast %62 : vector<16xf32> to vector<16x1xf32>
    %cst_36 = arith.constant 3.200000e+01 : f32
    %64 = vector.broadcast %cst_36 : f32 to vector<16x1xf32>
    %65 = arith.divf %63, %64 : vector<16x1xf32>
    %66 = vector.broadcast %58 : vector<16x1xf32> to vector<16x32xf32>
    %67 = arith.subf %50, %66 : vector<16x32xf32>
    %cst_37 = arith.constant 9.99999974E-6 : f32
    %68 = vector.broadcast %cst_37 : f32 to vector<16x1xf32>
    %69 = arith.addf %65, %68 : vector<16x1xf32>
    %70 = math.rsqrt %69 : vector<16x1xf32>
    %71 = vector.broadcast %70 : vector<16x1xf32> to vector<16x32xf32>
    %72 = arith.mulf %67, %71 : vector<16x32xf32>
    %73 = vector.broadcast %52 : vector<1x32xf32> to vector<16x32xf32>
    %74 = arith.mulf %72, %73 : vector<16x32xf32>
    %75 = vector.broadcast %54 : vector<1x32xf32> to vector<16x32xf32>
    %76 = arith.addf %74, %75 : vector<16x32xf32>
    %c0_38 = arith.constant 0 : index
    %c0_39 = arith.constant 0 : index
    %c0_40 = arith.constant 0 : index
    %77 = vector.load %arg11[%c0_38, %c0_39, %c0_40] : memref<2x32x128xf32, #tpu.memory_space<vmem>>, vector<1x32x128xf32>
    %78 = vector.shape_cast %77 : vector<1x32x128xf32> to vector<32x128xf32>
    %cst_41 = arith.constant dense<0.000000e+00> : vector<16x128xf32>
    %79 = tpu.matmul %76, %78, %cst_41 {dimension_numbers = #tpu.dot_dimension_numbers<[1], [0], [0], [1], [0, 0, 1, 1], [], []>} : vector<16x32xf32>, vector<32x128xf32>, vector<16x128xf32> -> vector<16x128xf32>
    %c0_42 = arith.constant 0 : index
    %c0_43 = arith.constant 0 : index
    %c0_44 = arith.constant 0 : index
    %80 = vector.load %arg12[%c0_42, %c0_43, %c0_44] : memref<2x1x128xf32, #tpu.memory_space<vmem>>, vector<1x1x128xf32>
    %81 = vector.shape_cast %80 : vector<1x1x128xf32> to vector<1x128xf32>
    %82 = vector.broadcast %81 : vector<1x128xf32> to vector<16x128xf32>
    %83 = arith.addf %79, %82 : vector<16x128xf32>
    %cst_45 = arith.constant 0.000000e+00 : f32
    %84 = vector.broadcast %cst_45 : f32 to vector<16x128xf32>
    %85 = arith.maximumf %83, %84 : vector<16x128xf32>
    %c0_46 = arith.constant 0 : index
    %c0_47 = arith.constant 0 : index
    %c0_48 = arith.constant 0 : index
    %86 = vector.load %arg13[%c0_46, %c0_47, %c0_48] : memref<2x128x32xf32, #tpu.memory_space<vmem>>, vector<1x128x32xf32>
    %87 = vector.shape_cast %86 : vector<1x128x32xf32> to vector<128x32xf32>
    %cst_49 = arith.constant dense<0.000000e+00> : vector<16x32xf32>
    %88 = tpu.matmul %85, %87, %cst_49 {dimension_numbers = #tpu.dot_dimension_numbers<[1], [0], [0], [1], [0, 0, 1, 1], [], []>} : vector<16x128xf32>, vector<128x32xf32>, vector<16x32xf32> -> vector<16x32xf32>
    %c0_50 = arith.constant 0 : index
    %c0_51 = arith.constant 0 : index
    %c0_52 = arith.constant 0 : index
    %89 = vector.load %arg14[%c0_50, %c0_51, %c0_52] : memref<2x1x32xf32, #tpu.memory_space<vmem>>, vector<1x1x32xf32>
    %90 = vector.shape_cast %89 : vector<1x1x32xf32> to vector<1x32xf32>
    %91 = vector.broadcast %90 : vector<1x32xf32> to vector<16x32xf32>
    %92 = arith.addf %88, %91 : vector<16x32xf32>
    %93 = arith.addf %76, %92 : vector<16x32xf32>
    %c0_53 = arith.constant 0 : index
    %c0_54 = arith.constant 0 : index
    %c0_55 = arith.constant 0 : index
    %94 = vector.load %arg15[%c0_53, %c0_54, %c0_55] : memref<2x1x32xf32, #tpu.memory_space<vmem>>, vector<1x1x32xf32>
    %95 = vector.shape_cast %94 : vector<1x1x32xf32> to vector<1x32xf32>
    %c0_56 = arith.constant 0 : index
    %c0_57 = arith.constant 0 : index
    %c0_58 = arith.constant 0 : index
    %96 = vector.load %arg16[%c0_56, %c0_57, %c0_58] : memref<2x1x32xf32, #tpu.memory_space<vmem>>, vector<1x1x32xf32>
    %97 = vector.shape_cast %96 : vector<1x1x32xf32> to vector<1x32xf32>
    %cst_59 = arith.constant dense<0.000000e+00> : vector<16xf32>
    %98 = vector.multi_reduction <add>, %93, %cst_59 [1] : vector<16x32xf32> to vector<16xf32>
    %99 = vector.shape_cast %98 : vector<16xf32> to vector<16x1xf32>
    %cst_60 = arith.constant 3.200000e+01 : f32
    %100 = vector.broadcast %cst_60 : f32 to vector<16x1xf32>
    %101 = arith.divf %99, %100 : vector<16x1xf32>
    %102 = vector.broadcast %101 : vector<16x1xf32> to vector<16x32xf32>
    %103 = arith.subf %93, %102 : vector<16x32xf32>
    %104 = arith.mulf %103, %103 : vector<16x32xf32>
    %cst_61 = arith.constant dense<0.000000e+00> : vector<16xf32>
    %105 = vector.multi_reduction <add>, %104, %cst_61 [1] : vector<16x32xf32> to vector<16xf32>
    %106 = vector.shape_cast %105 : vector<16xf32> to vector<16x1xf32>
    %cst_62 = arith.constant 3.200000e+01 : f32
    %107 = vector.broadcast %cst_62 : f32 to vector<16x1xf32>
    %108 = arith.divf %106, %107 : vector<16x1xf32>
    %109 = vector.broadcast %101 : vector<16x1xf32> to vector<16x32xf32>
    %110 = arith.subf %93, %109 : vector<16x32xf32>
    %cst_63 = arith.constant 9.99999974E-6 : f32
    %111 = vector.broadcast %cst_63 : f32 to vector<16x1xf32>
    %112 = arith.addf %108, %111 : vector<16x1xf32>
    %113 = math.rsqrt %112 : vector<16x1xf32>
    %114 = vector.broadcast %113 : vector<16x1xf32> to vector<16x32xf32>
    %115 = arith.mulf %110, %114 : vector<16x32xf32>
    %116 = vector.broadcast %95 : vector<1x32xf32> to vector<16x32xf32>
    %117 = arith.mulf %115, %116 : vector<16x32xf32>
    %118 = vector.broadcast %97 : vector<1x32xf32> to vector<16x32xf32>
    %119 = arith.addf %117, %118 : vector<16x32xf32>
    %c1 = arith.constant 1 : index
    %c0_64 = arith.constant 0 : index
    %c0_65 = arith.constant 0 : index
    %120 = vector.load %arg5[%c1, %c0_64, %c0_65] : memref<2x32x96xf32, #tpu.memory_space<vmem>>, vector<1x32x96xf32>
    %121 = vector.shape_cast %120 : vector<1x32x96xf32> to vector<32x96xf32>
    %cst_66 = arith.constant dense<0.000000e+00> : vector<16x96xf32>
    %122 = tpu.matmul %119, %121, %cst_66 {dimension_numbers = #tpu.dot_dimension_numbers<[1], [0], [0], [1], [0, 0, 1, 1], [], []>} : vector<16x32xf32>, vector<32x96xf32>, vector<16x96xf32> -> vector<16x96xf32>
    %c1_67 = arith.constant 1 : index
    %c0_68 = arith.constant 0 : index
    %c0_69 = arith.constant 0 : index
    %123 = vector.load %arg6[%c1_67, %c0_68, %c0_69] : memref<2x1x96xf32, #tpu.memory_space<vmem>>, vector<1x1x96xf32>
    %124 = vector.shape_cast %123 : vector<1x1x96xf32> to vector<1x96xf32>
    %125 = vector.broadcast %124 : vector<1x96xf32> to vector<16x96xf32>
    %126 = arith.addf %122, %125 : vector<16x96xf32>
    %127 = vector.extract_strided_slice %126 {offsets = [0, 0], sizes = [16, 32], strides = [1, 1]} : vector<16x96xf32> to vector<16x32xf32>
    %128 = vector.extract_strided_slice %126 {offsets = [0, 32], sizes = [16, 32], strides = [1, 1]} : vector<16x96xf32> to vector<16x32xf32>
    %129 = vector.extract_strided_slice %126 {offsets = [0, 64], sizes = [16, 32], strides = [1, 1]} : vector<16x96xf32> to vector<16x32xf32>
    %130 = vector.shape_cast %127 : vector<16x32xf32> to vector<1x16x32xf32>
    %131 = vector.broadcast %130 : vector<1x16x32xf32> to vector<4x16x32xf32>
    %132 = vector.broadcast %3 : vector<4x1x32xf32> to vector<4x16x32xf32>
    %133 = arith.mulf %131, %132 : vector<4x16x32xf32>
    %134 = vector.shape_cast %128 : vector<16x32xf32> to vector<1x16x32xf32>
    %135 = vector.broadcast %134 : vector<1x16x32xf32> to vector<4x16x32xf32>
    %136 = vector.shape_cast %129 : vector<16x32xf32> to vector<1x16x32xf32>
    %137 = vector.broadcast %136 : vector<1x16x32xf32> to vector<4x16x32xf32>
    "tpu.trace_start"() <{level = 10 : i32, message = "hmd,hnd->hmn"}> : () -> ()
    %cst_70 = arith.constant dense<0.000000e+00> : vector<4x16x16xf32>
    %138 = tpu.matmul %133, %135, %cst_70 {dimension_numbers = #tpu.dot_dimension_numbers<[2], [2], [1], [1], [0, 0, 0, 1, 1, 1], [0], [0]>} : vector<4x16x32xf32>, vector<4x16x32xf32>, vector<4x16x16xf32> -> vector<4x16x16xf32>
    "tpu.trace_stop"() : () -> ()
    %cst_71 = arith.constant 0.353553385 : f32
    %139 = vector.broadcast %cst_71 : f32 to vector<4x16x16xf32>
    %140 = arith.mulf %138, %139 : vector<4x16x16xf32>
    %141 = vector.shape_cast %4 : vector<16x16xf32> to vector<1x16x16xf32>
    %142 = vector.broadcast %141 : vector<1x16x16xf32> to vector<4x16x16xf32>
    %143 = arith.addf %140, %142 : vector<4x16x16xf32>
    %cst_72 = arith.constant dense<0xFF800000> : vector<4x16xf32>
    %144 = vector.multi_reduction <maximumf>, %143, %cst_72 [2] : vector<4x16x16xf32> to vector<4x16xf32>
    %145 = vector.shape_cast %144 : vector<4x16xf32> to vector<4x16x1xf32>
    %146 = vector.broadcast %145 : vector<4x16x1xf32> to vector<4x16x16xf32>
    %147 = arith.subf %143, %146 : vector<4x16x16xf32>
    %148 = math.exp %147 : vector<4x16x16xf32>
    %cst_73 = arith.constant dense<0.000000e+00> : vector<4x16xf32>
    %149 = vector.multi_reduction <add>, %148, %cst_73 [2] : vector<4x16x16xf32> to vector<4x16xf32>
    %150 = vector.shape_cast %149 : vector<4x16xf32> to vector<4x16x1xf32>
    %151 = tpu.reciprocal %150 {approx = true} : vector<4x16x1xf32> -> vector<4x16x1xf32>
    %152 = vector.broadcast %151 : vector<4x16x1xf32> to vector<4x16x16xf32>
    %153 = arith.mulf %148, %152 : vector<4x16x16xf32>
    "tpu.trace_start"() <{level = 10 : i32, message = "hmn,hnd->hmd"}> : () -> ()
    %cst_74 = arith.constant dense<0.000000e+00> : vector<4x16x32xf32>
    %154 = tpu.matmul %153, %137, %cst_74 {dimension_numbers = #tpu.dot_dimension_numbers<[2], [1], [1], [2], [0, 0, 0, 1, 1, 2], [0], [0]>} : vector<4x16x16xf32>, vector<4x16x32xf32>, vector<4x16x32xf32> -> vector<4x16x32xf32>
    "tpu.trace_stop"() : () -> ()
    %155 = vector.broadcast %3 : vector<4x1x32xf32> to vector<4x16x32xf32>
    %156 = arith.mulf %154, %155 : vector<4x16x32xf32>
    %cst_75 = arith.constant dense<0.000000e+00> : vector<16x32xf32>
    %157 = vector.multi_reduction <add>, %156, %cst_75 [0] : vector<4x16x32xf32> to vector<16x32xf32>
    %c1_76 = arith.constant 1 : index
    %c0_77 = arith.constant 0 : index
    %c0_78 = arith.constant 0 : index
    %158 = vector.load %arg7[%c1_76, %c0_77, %c0_78] : memref<2x32x32xf32, #tpu.memory_space<vmem>>, vector<1x32x32xf32>
    %159 = vector.shape_cast %158 : vector<1x32x32xf32> to vector<32x32xf32>
    %cst_79 = arith.constant dense<0.000000e+00> : vector<16x32xf32>
    %160 = tpu.matmul %157, %159, %cst_79 {dimension_numbers = #tpu.dot_dimension_numbers<[1], [0], [0], [1], [0, 0, 1, 1], [], []>} : vector<16x32xf32>, vector<32x32xf32>, vector<16x32xf32> -> vector<16x32xf32>
    %c1_80 = arith.constant 1 : index
    %c0_81 = arith.constant 0 : index
    %c0_82 = arith.constant 0 : index
    %161 = vector.load %arg8[%c1_80, %c0_81, %c0_82] : memref<2x1x32xf32, #tpu.memory_space<vmem>>, vector<1x1x32xf32>
    %162 = vector.shape_cast %161 : vector<1x1x32xf32> to vector<1x32xf32>
    %163 = vector.broadcast %162 : vector<1x32xf32> to vector<16x32xf32>
    %164 = arith.addf %160, %163 : vector<16x32xf32>
    %165 = arith.addf %119, %164 : vector<16x32xf32>
    %c1_83 = arith.constant 1 : index
    %c0_84 = arith.constant 0 : index
    %c0_85 = arith.constant 0 : index
    %166 = vector.load %arg9[%c1_83, %c0_84, %c0_85] : memref<2x1x32xf32, #tpu.memory_space<vmem>>, vector<1x1x32xf32>
    %167 = vector.shape_cast %166 : vector<1x1x32xf32> to vector<1x32xf32>
    %c1_86 = arith.constant 1 : index
    %c0_87 = arith.constant 0 : index
    %c0_88 = arith.constant 0 : index
    %168 = vector.load %arg10[%c1_86, %c0_87, %c0_88] : memref<2x1x32xf32, #tpu.memory_space<vmem>>, vector<1x1x32xf32>
    %169 = vector.shape_cast %168 : vector<1x1x32xf32> to vector<1x32xf32>
    %cst_89 = arith.constant dense<0.000000e+00> : vector<16xf32>
    %170 = vector.multi_reduction <add>, %165, %cst_89 [1] : vector<16x32xf32> to vector<16xf32>
    %171 = vector.shape_cast %170 : vector<16xf32> to vector<16x1xf32>
    %cst_90 = arith.constant 3.200000e+01 : f32
    %172 = vector.broadcast %cst_90 : f32 to vector<16x1xf32>
    %173 = arith.divf %171, %172 : vector<16x1xf32>
    %174 = vector.broadcast %173 : vector<16x1xf32> to vector<16x32xf32>
    %175 = arith.subf %165, %174 : vector<16x32xf32>
    %176 = arith.mulf %175, %175 : vector<16x32xf32>
    %cst_91 = arith.constant dense<0.000000e+00> : vector<16xf32>
    %177 = vector.multi_reduction <add>, %176, %cst_91 [1] : vector<16x32xf32> to vector<16xf32>
    %178 = vector.shape_cast %177 : vector<16xf32> to vector<16x1xf32>
    %cst_92 = arith.constant 3.200000e+01 : f32
    %179 = vector.broadcast %cst_92 : f32 to vector<16x1xf32>
    %180 = arith.divf %178, %179 : vector<16x1xf32>
    %181 = vector.broadcast %173 : vector<16x1xf32> to vector<16x32xf32>
    %182 = arith.subf %165, %181 : vector<16x32xf32>
    %cst_93 = arith.constant 9.99999974E-6 : f32
    %183 = vector.broadcast %cst_93 : f32 to vector<16x1xf32>
    %184 = arith.addf %180, %183 : vector<16x1xf32>
    %185 = math.rsqrt %184 : vector<16x1xf32>
    %186 = vector.broadcast %185 : vector<16x1xf32> to vector<16x32xf32>
    %187 = arith.mulf %182, %186 : vector<16x32xf32>
    %188 = vector.broadcast %167 : vector<1x32xf32> to vector<16x32xf32>
    %189 = arith.mulf %187, %188 : vector<16x32xf32>
    %190 = vector.broadcast %169 : vector<1x32xf32> to vector<16x32xf32>
    %191 = arith.addf %189, %190 : vector<16x32xf32>
    %c1_94 = arith.constant 1 : index
    %c0_95 = arith.constant 0 : index
    %c0_96 = arith.constant 0 : index
    %192 = vector.load %arg11[%c1_94, %c0_95, %c0_96] : memref<2x32x128xf32, #tpu.memory_space<vmem>>, vector<1x32x128xf32>
    %193 = vector.shape_cast %192 : vector<1x32x128xf32> to vector<32x128xf32>
    %cst_97 = arith.constant dense<0.000000e+00> : vector<16x128xf32>
    %194 = tpu.matmul %191, %193, %cst_97 {dimension_numbers = #tpu.dot_dimension_numbers<[1], [0], [0], [1], [0, 0, 1, 1], [], []>} : vector<16x32xf32>, vector<32x128xf32>, vector<16x128xf32> -> vector<16x128xf32>
    %c1_98 = arith.constant 1 : index
    %c0_99 = arith.constant 0 : index
    %c0_100 = arith.constant 0 : index
    %195 = vector.load %arg12[%c1_98, %c0_99, %c0_100] : memref<2x1x128xf32, #tpu.memory_space<vmem>>, vector<1x1x128xf32>
    %196 = vector.shape_cast %195 : vector<1x1x128xf32> to vector<1x128xf32>
    %197 = vector.broadcast %196 : vector<1x128xf32> to vector<16x128xf32>
    %198 = arith.addf %194, %197 : vector<16x128xf32>
    %cst_101 = arith.constant 0.000000e+00 : f32
    %199 = vector.broadcast %cst_101 : f32 to vector<16x128xf32>
    %200 = arith.maximumf %198, %199 : vector<16x128xf32>
    %c1_102 = arith.constant 1 : index
    %c0_103 = arith.constant 0 : index
    %c0_104 = arith.constant 0 : index
    %201 = vector.load %arg13[%c1_102, %c0_103, %c0_104] : memref<2x128x32xf32, #tpu.memory_space<vmem>>, vector<1x128x32xf32>
    %202 = vector.shape_cast %201 : vector<1x128x32xf32> to vector<128x32xf32>
    %cst_105 = arith.constant dense<0.000000e+00> : vector<16x32xf32>
    %203 = tpu.matmul %200, %202, %cst_105 {dimension_numbers = #tpu.dot_dimension_numbers<[1], [0], [0], [1], [0, 0, 1, 1], [], []>} : vector<16x128xf32>, vector<128x32xf32>, vector<16x32xf32> -> vector<16x32xf32>
    %c1_106 = arith.constant 1 : index
    %c0_107 = arith.constant 0 : index
    %c0_108 = arith.constant 0 : index
    %204 = vector.load %arg14[%c1_106, %c0_107, %c0_108] : memref<2x1x32xf32, #tpu.memory_space<vmem>>, vector<1x1x32xf32>
    %205 = vector.shape_cast %204 : vector<1x1x32xf32> to vector<1x32xf32>
    %206 = vector.broadcast %205 : vector<1x32xf32> to vector<16x32xf32>
    %207 = arith.addf %203, %206 : vector<16x32xf32>
    %208 = arith.addf %191, %207 : vector<16x32xf32>
    %c1_109 = arith.constant 1 : index
    %c0_110 = arith.constant 0 : index
    %c0_111 = arith.constant 0 : index
    %209 = vector.load %arg15[%c1_109, %c0_110, %c0_111] : memref<2x1x32xf32, #tpu.memory_space<vmem>>, vector<1x1x32xf32>
    %210 = vector.shape_cast %209 : vector<1x1x32xf32> to vector<1x32xf32>
    %c1_112 = arith.constant 1 : index
    %c0_113 = arith.constant 0 : index
    %c0_114 = arith.constant 0 : index
    %211 = vector.load %arg16[%c1_112, %c0_113, %c0_114] : memref<2x1x32xf32, #tpu.memory_space<vmem>>, vector<1x1x32xf32>
    %212 = vector.shape_cast %211 : vector<1x1x32xf32> to vector<1x32xf32>
    %cst_115 = arith.constant dense<0.000000e+00> : vector<16xf32>
    %213 = vector.multi_reduction <add>, %208, %cst_115 [1] : vector<16x32xf32> to vector<16xf32>
    %214 = vector.shape_cast %213 : vector<16xf32> to vector<16x1xf32>
    %cst_116 = arith.constant 3.200000e+01 : f32
    %215 = vector.broadcast %cst_116 : f32 to vector<16x1xf32>
    %216 = arith.divf %214, %215 : vector<16x1xf32>
    %217 = vector.broadcast %216 : vector<16x1xf32> to vector<16x32xf32>
    %218 = arith.subf %208, %217 : vector<16x32xf32>
    %219 = arith.mulf %218, %218 : vector<16x32xf32>
    %cst_117 = arith.constant dense<0.000000e+00> : vector<16xf32>
    %220 = vector.multi_reduction <add>, %219, %cst_117 [1] : vector<16x32xf32> to vector<16xf32>
    %221 = vector.shape_cast %220 : vector<16xf32> to vector<16x1xf32>
    %cst_118 = arith.constant 3.200000e+01 : f32
    %222 = vector.broadcast %cst_118 : f32 to vector<16x1xf32>
    %223 = arith.divf %221, %222 : vector<16x1xf32>
    %224 = vector.broadcast %216 : vector<16x1xf32> to vector<16x32xf32>
    %225 = arith.subf %208, %224 : vector<16x32xf32>
    %cst_119 = arith.constant 9.99999974E-6 : f32
    %226 = vector.broadcast %cst_119 : f32 to vector<16x1xf32>
    %227 = arith.addf %223, %226 : vector<16x1xf32>
    %228 = math.rsqrt %227 : vector<16x1xf32>
    %229 = vector.broadcast %228 : vector<16x1xf32> to vector<16x32xf32>
    %230 = arith.mulf %225, %229 : vector<16x32xf32>
    %231 = vector.broadcast %210 : vector<1x32xf32> to vector<16x32xf32>
    %232 = arith.mulf %230, %231 : vector<16x32xf32>
    %233 = vector.broadcast %212 : vector<1x32xf32> to vector<16x32xf32>
    %234 = arith.addf %232, %233 : vector<16x32xf32>
    %c0_120 = arith.constant 0 : index
    %c0_121 = arith.constant 0 : index
    %235 = vector.load %arg17[%c0_120, %c0_121] : memref<16x32xf32, #tpu.memory_space<vmem>>, vector<16x32xf32>
    tpu.vector_store %arg17[%c0_120, %c0_121], %234 {strides = array<i32>} : memref<16x32xf32, #tpu.memory_space<vmem>>, vector<16x32xf32>,
    return
  }
  func.func @transform_0(%arg0: i32) -> (i32, i32) {
    %c0_i32 = arith.constant 0 : i32
    %c0_i32_0 = arith.constant 0 : i32
    %c0_i32_1 = arith.constant 0 : i32
    return %c0_i32, %c0_i32_0 : i32, i32
  }
  func.func @transform_1(%arg0: i32) -> (i32, i32) {
    %c0_i32 = arith.constant 0 : i32
    %c0_i32_0 = arith.constant 0 : i32
    %c0_i32_1 = arith.constant 0 : i32
    return %c0_i32, %c0_i32_0 : i32, i32
  }
  func.func @transform_2(%arg0: i32) -> (i32, i32, i32) {
    %c0_i32 = arith.constant 0 : i32
    %c0_i32_0 = arith.constant 0 : i32
    %c0_i32_1 = arith.constant 0 : i32
    %c0_i32_2 = arith.constant 0 : i32
    return %c0_i32, %c0_i32_0, %c0_i32_1 : i32, i32, i32
  }
  func.func @transform_3(%arg0: i32) -> (i32, i32) {
    %c0_i32 = arith.constant 0 : i32
    %c0_i32_0 = arith.constant 0 : i32
    %c0_i32_1 = arith.constant 0 : i32
    return %c0_i32, %c0_i32_0 : i32, i32
  }
  func.func @transform_4(%arg0: i32) -> (i32, i32, i32) {
    %c0_i32 = arith.constant 0 : i32
    %c0_i32_0 = arith.constant 0 : i32
    %c0_i32_1 = arith.constant 0 : i32
    %c0_i32_2 = arith.constant 0 : i32
    return %c0_i32, %c0_i32_0, %c0_i32_1 : i32, i32, i32
  }
  func.func @transform_5(%arg0: i32) -> (i32, i32, i32) {
    %c0_i32 = arith.constant 0 : i32
    %c0_i32_0 = arith.constant 0 : i32
    %c0_i32_1 = arith.constant 0 : i32
    %c0_i32_2 = arith.constant 0 : i32
    return %c0_i32, %c0_i32_0, %c0_i32_1 : i32, i32, i32
  }
  func.func @transform_6(%arg0: i32) -> (i32, i32, i32) {
    %c0_i32 = arith.constant 0 : i32
    %c0_i32_0 = arith.constant 0 : i32
    %c0_i32_1 = arith.constant 0 : i32
    %c0_i32_2 = arith.constant 0 : i32
    return %c0_i32, %c0_i32_0, %c0_i32_1 : i32, i32, i32
  }
  func.func @transform_7(%arg0: i32) -> (i32, i32, i32) {
    %c0_i32 = arith.constant 0 : i32
    %c0_i32_0 = arith.constant 0 : i32
    %c0_i32_1 = arith.constant 0 : i32
    %c0_i32_2 = arith.constant 0 : i32
    return %c0_i32, %c0_i32_0, %c0_i32_1 : i32, i32, i32
  }
  func.func @transform_8(%arg0: i32) -> (i32, i32, i32) {
    %c0_i32 = arith.constant 0 : i32
    %c0_i32_0 = arith.constant 0 : i32
    %c0_i32_1 = arith.constant 0 : i32
    %c0_i32_2 = arith.constant 0 : i32
    return %c0_i32, %c0_i32_0, %c0_i32_1 : i32, i32, i32
  }
  func.func @transform_9(%arg0: i32) -> (i32, i32, i32) {
    %c0_i32 = arith.constant 0 : i32
    %c0_i32_0 = arith.constant 0 : i32
    %c0_i32_1 = arith.constant 0 : i32
    %c0_i32_2 = arith.constant 0 : i32
    return %c0_i32, %c0_i32_0, %c0_i32_1 : i32, i32, i32
  }
  func.func @transform_10(%arg0: i32) -> (i32, i32, i32) {
    %c0_i32 = arith.constant 0 : i32
    %c0_i32_0 = arith.constant 0 : i32
    %c0_i32_1 = arith.constant 0 : i32
    %c0_i32_2 = arith.constant 0 : i32
    return %c0_i32, %c0_i32_0, %c0_i32_1 : i32, i32, i32
  }
  func.func @transform_11(%arg0: i32) -> (i32, i32, i32) {
    %c0_i32 = arith.constant 0 : i32
    %c0_i32_0 = arith.constant 0 : i32
    %c0_i32_1 = arith.constant 0 : i32
    %c0_i32_2 = arith.constant 0 : i32
    return %c0_i32, %c0_i32_0, %c0_i32_1 : i32, i32, i32
  }
  func.func @transform_12(%arg0: i32) -> (i32, i32, i32) {
    %c0_i32 = arith.constant 0 : i32
    %c0_i32_0 = arith.constant 0 : i32
    %c0_i32_1 = arith.constant 0 : i32
    %c0_i32_2 = arith.constant 0 : i32
    return %c0_i32, %c0_i32_0, %c0_i32_1 : i32, i32, i32
  }
  func.func @transform_13(%arg0: i32) -> (i32, i32, i32) {
    %c0_i32 = arith.constant 0 : i32
    %c0_i32_0 = arith.constant 0 : i32
    %c0_i32_1 = arith.constant 0 : i32
    %c0_i32_2 = arith.constant 0 : i32
    return %c0_i32, %c0_i32_0, %c0_i32_1 : i32, i32, i32
  }
  func.func @transform_14(%arg0: i32) -> (i32, i32, i32) {
    %c0_i32 = arith.constant 0 : i32
    %c0_i32_0 = arith.constant 0 : i32
    %c0_i32_1 = arith.constant 0 : i32
    %c0_i32_2 = arith.constant 0 : i32
    return %c0_i32, %c0_i32_0, %c0_i32_1 : i32, i32, i32
  }
  func.func @transform_15(%arg0: i32) -> (i32, i32, i32) {
    %c0_i32 = arith.constant 0 : i32
    %c0_i32_0 = arith.constant 0 : i32
    %c0_i32_1 = arith.constant 0 : i32
    %c0_i32_2 = arith.constant 0 : i32
    return %c0_i32, %c0_i32_0, %c0_i32_1 : i32, i32, i32
  }
  func.func @transform_16(%arg0: i32) -> (i32, i32) {
    %c0_i32 = arith.constant 0 : i32
    %c0_i32_0 = arith.constant 0 : i32
    %c0_i32_1 = arith.constant 0 : i32
    return %c0_i32, %c0_i32_0 : i32, i32
  }
}

</mosaic_0001>

<bundles_post_ra>
// kernel: transformer_encoder.1
= control target key start
LH: loop header
LB: loop body
LE: loop exit
PB: predicated region body
PF: predicated region fallthrough
CT: control target
= control target key end

     0   :  { %s4112_s0 = inlined_call_operand.vmem [shape: f32[16,32], index: 0, kind: input, shape index: {}]   ;;  %s4113_s1 = inlined_call_operand.vmem [shape: f32[16,32], index: 1, kind: input, shape index: {}]   ;;  %s4114_s2 = inlined_call_operand.vmem [shape: f32[4,1,32], index: 2, kind: input, shape index: {}]   ;;  %s4115_s3 = inlined_call_operand.vmem [shape: f32[16,16], index: 3, kind: input, shape index: {}]   ;;  %s4116_s4 = inlined_call_operand.vmem [shape: f32[2,32,96], index: 4, kind: input, shape index: {}]   ;;  %s4117_s5 = inlined_call_operand.vmem [shape: f32[2,1,96], index: 5, kind: input, shape index: {}]   ;;  %s4118_s6 = inlined_call_operand.vmem [shape: f32[2,32,32], index: 6, kind: input, shape index: {}]   ;;  %s4119_s7 = inlined_call_operand.vmem [shape: f32[2,1,32], index: 7, kind: input, shape index: {}]   ;;  %s4120_s8 = inlined_call_operand.vmem [shape: f32[2,1,32], index: 8, kind: input, shape index: {}]   ;;  %s4121_s9 = inlined_call_operand.vmem [shape: f32[2,1,32], index: 9, kind: input, shape index: {}]   ;;  %s4122_s10 = inlined_call_operand.vmem [shape: f32[2,32,128], index: 10, kind: input, shape index: {}]   ;;  %s4123_s11 = inlined_call_operand.vmem [shape: f32[2,1,128], index: 11, kind: input, shape index: {}]   ;;  %s4124_s12 = inlined_call_operand.vmem [shape: f32[2,128,32], index: 12, kind: input, shape index: {}]   ;;  %s4125_s13 = inlined_call_operand.vmem [shape: f32[2,1,32], index: 13, kind: input, shape index: {}]   ;;  %s4126_s14 = inlined_call_operand.vmem [shape: f32[2,1,32], index: 14, kind: input, shape index: {}]   ;;  %s4127_s15 = inlined_call_operand.vmem [shape: f32[2,1,32], index: 15, kind: input, shape index: {}]   ;;  %s4128_s16 = inlined_call_operand.hbm [shape: f32[16,32], index: 16, kind: output, shape index: {}]  }
   0x1   :  { %4130 = sst [smem:[#allocation5_spill]] %s4112_s0 }
   0x2   :  { %v66_v0 = vld [vmem:[%s4116_s4] sm:$0xff]  ;;  %v67_v1 = vld [vmem:[%s4116_s4 + $0x8] sm:$0xff]  ;;  %v68_v2 = vld [vmem:[%s4116_s4 + $0x10] sm:$0xff]  ;;  %s4131_s0 = sld [smem:[#allocation5_spill]]  ;;  %vm77_vm0 = vcmask 261120  }
   0x3   :  { %v3155_v3 = vpack.c.bf16 %v67_v1, %v66_v0  ;;  %v69_v4 = vld [vmem:[%s4116_s4 + $0x18] sm:$0xff]  ;;  %v56_v6 = vld [vmem:[%s4113_s1] sm:$0xff] }
   0x4   :  { %v3159_v7 = vpack.c.bf16 %v69_v4, %v68_v2 }
   0x8   :  { %v54_v5 = vld [vmem:[%s4131_s0] sm:$0xff] }
   0x9   :  { %v3588_v8 = vadd.f32 %v56_v6, %v54_v5 }
   0xa   :  { %21 = vsyncpa [#allocation3], 0  ;;  %3156 = vmatprep.subr.bf16.mxu1 %v3155_v3  ;;  %v55_v9 = vld [vmem:[%s4131_s0 + $0x8] sm:$0xff]  ;;  %v2655_v12 = vld [vmem:[%s4117_s5] ss:$0 sm:$0xff]  ;;  %s3480_s28 = smov 96  }
   0xb   :  { %3158 = vmatpush3.bf16.msra.mxu1 %v3155_v3  ;;  %2915 = vmatprep.mubr.msk.f32.mxu1 %vm77_vm0, %v3588_v8  ;;  %v57_v10 = vld [vmem:[%s4113_s1 + $0x8] sm:$0xff]  ;;  %v3608_v16 = vld [vmem:[%s4114_s2] ss:$0 sm:$0xff]  ;;  %v3613_v17 = vld [vmem:[%s4114_s2 + $0x3] ss:$0 sm:$0xff]  ;;  %vm541_vm2 = vcmask 130048  }
   0xc   :  { %3160 = vmatprep.subr.bf16.mxu1 %v3159_v7  ;;  %v3598_v11 = vadd.f32 %v57_v10, %v55_v9  ;;  %vm3625_vm1 = vmpackc.low %vm77_vm0, %vm77_vm0  ;;  %v3642_v27 = vld [vmem:[%s4114_s2 + $0x1] ss:$0 sm:$0xff]  ;;  %v3657_v31 = vld [vmem:[%s4114_s2 + $0x2] ss:$0 sm:$0xff] }
   0xd   :  { %v3670_v37 = vld [vmem:[%s4115_s3 + $0x8] sm:$0xff]  ;;  %v3675_v41 = vld [vmem:[%s4115_s3] sm:$0xff]  ;;  %s3481_s3 = smov 64  }
   0xf   :  { %3162 = vmatpush3.bf16.msra.mxu1 %v3159_v7 }
  0x12   :  { %2916 = vmatmul.mubr.msk.f32.vlgmr.msra.gmra.mrb[0].mxu1 %vm77_vm0, %v3598_v11 }
  0xe5   :  { %v2917_v13 = vpop.f32.mrb[0].mxu1 }
  0xe6   :  { %v156_v14 = vadd.f32 %v2917_v13, %v2655_v12  ;;  %v150_v15 = vpop.f32.mrb[1].mxu1 }
  0xe7   :  { %v151_v18 = vadd.f32 %v2655_v12, %v150_v15 }
  0xe8   :  { %v184_v28 = vmul.f32 %v3608_v16, %v156_v14  ;;  %v190_v29 = vmul.f32 %v3613_v17, %v156_v14  ;;  %v186_v32 = vmul.f32 %v3642_v27, %v156_v14  ;;  %v188_v34 = vmul.f32 %v3657_v31, %v156_v14 }
  0xe9   :  { %v3615_v19 = vpack.i.bf16 %v156_v14, %v151_v18  ;;  %v183_v20 = vmul.f32 %v3608_v16, %v151_v18  ;;  %v189_v21 = vmul.f32 %v3613_v17, %v151_v18  ;;  %v185_v30 = vmul.f32 %v3642_v27, %v151_v18 }
  0xea   :  { %v187_v33 = vmul.f32 %v3657_v31, %v151_v18 }
  0xeb   :  { %3353 = vrot.lane.b32.xlu0 %v3615_v19, %s3480_s28  ;;  %2922 = vmatprep.mubr.msk.f32.mxu1 %vm77_vm0, %v183_v20 }
  0xec   :  { %2943 = vmatprep.mubr.msk.f32.mxu0 %vm77_vm0, %v189_v21 }
 0x15d   :  { %v3354_v22 = vpop.permute.xlu0 %3353 }
 0x15e   :  { %v3356_v23 = vunpack.i.h.bf16 %v3354_v22  ;;  %v3355_v24 = vunpack.i.l.bf16 %v3354_v22 }
 0x160   :  { %v3163_v26 = vpack.c.bf16 %v3356_v23, %v3355_v24 }
 0x162   :  { %3165 = vmatprep.subr.msk.bf16.mxu1 %vm3625_vm1, %v3163_v26  ;;  %3183 = vmatprep.subr.msk.bf16.mxu0 %vm3625_vm1, %v3163_v26 }
 0x163   :  { %3168 = vmatpush3.bf16.xpose.msk.msra.mxu1 %vm3625_vm1, %v3163_v26  ;;  %3186 = vmatpush3.bf16.xpose.msk.msra.mxu0 %vm3625_vm1, %v3163_v26 }
 0x164   :  { %3171 = vmatprep.subr.msk.bf16.mxu1 %vm3625_vm1, %v3163_v26 }
 0x16a   :  { %2923 = vmatmul.mubr.msk.f32.vlgmr.msra.gmra.mrb[2].mxu1 %vm77_vm0, %v184_v28  ;;  %2944 = vmatmul.mubr.msk.f32.vlgmr.msra.gmra.mrb[0].mxu0 %vm77_vm0, %v190_v29 }
 0x16b   :  { %3174 = vmatpush3.bf16.xpose.msk.msra.mxu1 %vm3625_vm1, %v3163_v26  ;;  %2929 = vmatprep.mubr.msk.f32.mxu1 %vm77_vm0, %v185_v30 }
 0x16c   :  { %3177 = vmatprep.subr.msk.bf16.mxu1 %vm3625_vm1, %v3163_v26 }
 0x172   :  { %2930 = vmatmul.mubr.msk.f32.vlgmr.msra.gmra.mrb[4].mxu1 %vm77_vm0, %v186_v32 }
 0x173   :  { %3180 = vmatpush3.bf16.xpose.msk.msra.mxu1 %vm3625_vm1, %v3163_v26  ;;  %2936 = vmatprep.mubr.msk.f32.mxu1 %vm77_vm0, %v187_v33 }
 0x17a   :  { %2937 = vmatmul.mubr.msk.f32.vlgmr.msra.gmra.mrb[6].mxu1 %vm77_vm0, %v188_v34 }
 0x23d   :  { %v2924_v35 = vpop.f32.mrb[2].mxu1  ;;  %v2945_v36 = vpop.f32.mrb[0].mxu0 }
 0x23e   :  { %v526_v38 = vmul.f32 0.35355338, %v2924_v35  ;;  %v273_v39 = vpop.f32.mrb[3].mxu1  ;;  %v516_v40 = vpop.f32.mrb[1].mxu0  ;;  %v532_v63 = vmul.f32 0.35355338, %v2945_v36 }
 0x23f   :  { %v525_v42 = vmul.f32 0.35355338, %v273_v39  ;;  %v531_v43 = vmul.f32 0.35355338, %v516_v40 }
 0x240   :  { %v534_v44 = vadd.f32 %v526_v38, %v3670_v37  ;;  %v540_v3 = vadd.f32 %v532_v63, %v3670_v37 }
 0x241   :  { %v533_v45 = vadd.f32 %v525_v42, %v3675_v41  ;;  %v539_v47 = vadd.f32 %v531_v43, %v3675_v41 }
 0x242   :  { %v545_v46 = vsel %vm541_vm2, %v534_v44, -inf  ;;  %v563_v4 = vsel %vm541_vm2, %v540_v3, -inf }
 0x243   :  { %546 = vmax.xlane.f32.xlu1 %v545_v46  ;;  %v542_v48 = vsel %vm541_vm2, %v533_v45, -inf  ;;  %v560_v52 = vsel %vm541_vm2, %v539_v47, -inf }
 0x244   :  { %543 = vmax.xlane.f32.xlu0 %v542_v48 }
 0x245   :  { %v2931_v49 = vpop.f32.mrb[4].mxu1 }
 0x246   :  { %v528_v50 = vmul.f32 0.35355338, %v2931_v49  ;;  %v354_v51 = vpop.f32.mrb[5].mxu1 }
 0x247   :  { %v527_v53 = vmul.f32 0.35355338, %v354_v51  ;;  %561 = vmax.xlane.f32.xlu1 %v560_v52 }
 0x248   :  { %v536_v54 = vadd.f32 %v528_v50, %v3670_v37 }
 0x249   :  { %v535_v56 = vadd.f32 %v527_v53, %v3675_v41 }
 0x24a   :  { %v551_v55 = vsel %vm541_vm2, %v536_v54, -inf }
 0x24b   :  { %552 = vmax.xlane.f32.xlu1 %v551_v55  ;;  %v548_v60 = vsel %vm541_vm2, %v535_v56, -inf }
 0x24d   :  { %v2938_v57 = vpop.f32.mrb[6].mxu1 }
 0x24e   :  { %v530_v58 = vmul.f32 0.35355338, %v2938_v57  ;;  %v435_v59 = vpop.f32.mrb[7].mxu1 }
 0x24f   :  { %v529_v61 = vmul.f32 0.35355338, %v435_v59  ;;  %549 = vmax.xlane.f32.xlu1 %v548_v60 }
 0x250   :  { %v538_v62 = vadd.f32 %v530_v58, %v3670_v37 }
 0x251   :  { %v537_v1 = vadd.f32 %v529_v61, %v3675_v41 }
 0x252   :  { %v557_v0 = vsel %vm541_vm2, %v538_v62, -inf }
 0x253   :  { %558 = vmax.xlane.f32.xlu1 %v557_v0  ;;  %v554_v2 = vsel %vm541_vm2, %v537_v1, -inf }
 0x257   :  { %555 = vmax.xlane.f32.xlu1 %v554_v2 }
 0x25b   :  { %564 = vmax.xlane.f32.xlu1 %v563_v4 }
 0x2d0   :  { %v547_v5 = vpop.xlane.xlu1 %546 }
 0x2d1   :  { %v567_v6 = vsub.f32 %v534_v44, %v547_v5  ;;  %v544_v7 = vpop.xlane.xlu0 %543 }
 0x2d2   :  { %v566_v9 = vsub.f32 %v533_v45, %v544_v7 }
 0x2d3   :  { %v576_v10 = vmul.f32 1.442695, %v567_v6 }
 0x2d4   :  { %v574_v12 = vmul.f32 1.442695, %v566_v9  ;;  %v562_v13 = vpop.xlane.xlu1 %561 }
 0x2d5   :  { %3372 = vpow2.f32 %v576_v10  ;;  %v572_v14 = vsub.f32 %v539_v47, %v562_v13 }
 0x2d6   :  { %3374 = vpow2.f32 %v574_v12 }
 0x2d7   :  { %v586_v15 = vmul.f32 1.442695, %v572_v14 }
 0x2d8   :  { %v553_v18 = vpop.xlane.xlu1 %552 }
 0x2d9   :  { %3376 = vpow2.f32 %v586_v15  ;;  %v569_v20 = vsub.f32 %v536_v54, %v553_v18 }
 0x2db   :  { %v580_v21 = vmul.f32 1.442695, %v569_v20 }
 0x2dc   :  { %v550_v22 = vpop.xlane.xlu1 %549 }
 0x2dd   :  { %3378 = vpow2.f32 %v580_v21  ;;  %v568_v23 = vsub.f32 %v535_v56, %v550_v22 }
 0x2df   :  { %v3693_v24 = vpop.eup %3372  ;;  %v578_v26 = vmul.f32 1.442695, %v568_v23  ;;  %v982_v23 = vld [vmem:[%s4118_s6] sm:$0xff] }
 0x2e0   :  { %v559_v28 = vpop.xlane.xlu1 %558  ;;  %v593_v29 = vsel %vm541_vm2, %v3693_v24, 0.0  ;;  %v3375_v30 = vpop.eup %3374 }
 0x2e1   :  { %3380 = vpow2.f32 %v578_v26  ;;  %v571_v32 = vsub.f32 %v538_v62, %v559_v28  ;;  %594 = vadd.xlane.f32.xlu1 %v593_v29  ;;  %v590_v38 = vsel %vm541_vm2, %v3375_v30, 0.0  ;;  %v984_v28 = vld [vmem:[%s4118_s6 + $0x10] sm:$0xff]  ;;  %v985_v29 = vld [vmem:[%s4118_s6 + $0x18] sm:$0xff] }
 0x2e3   :  { %v3697_v33 = vpop.eup %3376  ;;  %v584_v34 = vmul.f32 1.442695, %v571_v32 }
 0x2e4   :  { %v556_v35 = vpop.xlane.xlu1 %555  ;;  %v608_v36 = vsel %vm541_vm2, %v3697_v33, 0.0 }
 0x2e5   :  { %3382 = vpow2.f32 %v584_v34  ;;  %v570_v39 = vsub.f32 %v537_v1, %v556_v35  ;;  %609 = vadd.xlane.f32.xlu0 %v608_v36  ;;  %591 = vadd.xlane.f32.xlu1 %v590_v38 }
 0x2e7   :  { %v3702_v40 = vpop.eup %3378  ;;  %v582_v42 = vmul.f32 1.442695, %v570_v39 }
 0x2e8   :  { %v565_v43 = vpop.xlane.xlu1 %564  ;;  %v599_v44 = vsel %vm541_vm2, %v3702_v40, 0.0 }
 0x2e9   :  { %3384 = vpow2.f32 %v582_v42  ;;  %v573_v45 = vsub.f32 %v540_v3, %v565_v43  ;;  %600 = vadd.xlane.f32.xlu1 %v599_v44 }
 0x2eb   :  { %v3381_v46 = vpop.eup %3380  ;;  %v588_v47 = vmul.f32 1.442695, %v573_v45 }
 0x2ec   :  { %v596_v48 = vsel %vm541_vm2, %v3381_v46, 0.0 }
 0x2ed   :  { %3386 = vpow2.f32 %v588_v47  ;;  %597 = vadd.xlane.f32.xlu0 %v596_v48 }
 0x2ef   :  { %v3383_v49 = vpop.eup %3382 }
 0x2f0   :  { %v605_v50 = vsel %vm541_vm2, %v3383_v49, 0.0 }
 0x2f1   :  { %606 = vadd.xlane.f32.xlu1 %v605_v50 }
 0x2f3   :  { %v3385_v51 = vpop.eup %3384 }
 0x2f4   :  { %v602_v52 = vsel %vm541_vm2, %v3385_v51, 0.0 }
 0x2f5   :  { %603 = vadd.xlane.f32.xlu0 %v602_v52 }
 0x2f7   :  { %v3387_v53 = vpop.eup %3386 }
 0x2f8   :  { %v611_v54 = vsel %vm541_vm2, %v3387_v53, 0.0 }
 0x2f9   :  { %612 = vadd.xlane.f32.xlu1 %v611_v54 }
 0x30b   :  { %3358 = vrot.lane.b32.xlu0 %v3615_v19, %s3481_s3 }
 0x36e   :  { %v595_v55 = vpop.xlane.xlu1 %594 }
 0x372   :  { %v592_v56 = vpop.xlane.xlu1 %591  ;;  %v610_v57 = vpop.xlane.xlu0 %609 }
 0x373   :  { %3388 = vrcp.f32 %v592_v56 }
 0x374   :  { %3390 = vrcp.f32 %v595_v55 }
 0x376   :  { %v601_v58 = vpop.xlane.xlu1 %600 }
 0x37a   :  { %v598_v60 = vpop.xlane.xlu0 %597 }
 0x37b   :  { %3392 = vrcp.f32 %v598_v60 }
 0x37d   :  { %v3389_v59 = vpop.eup %3388 }
 0x37e   :  { %v607_v61 = vpop.xlane.xlu1 %606  ;;  %v622_v62 = vmul.f32 %v3389_v59, %v3375_v30  ;;  %v3391_v4 = vpop.eup %3390  ;;  %v3207_v30 = vpack.c.bf16 %v985_v29, %v984_v28  ;;  %v1215_v29 = vld [vmem:[%s4124_s12] sm:$0xff] }
 0x37f   :  { %3394 = vrcp.f32 %v607_v61  ;;  %v623_v9 = vmul.f32 %v3391_v4, %v3693_v24  ;;  %v983_v24 = vld [vmem:[%s4118_s6 + $0x8] sm:$0xff] }
 0x380   :  { %2950 = vmatprep.mubr.msk.f32.mxu1 %vm541_vm2, %v622_v62  ;;  %v3203_v26 = vpack.c.bf16 %v983_v24, %v982_v23  ;;  %v1123_v24 = vld [vmem:[%s4122_s10 + $0x10] sm:$0xff] }
 0x382   :  { %v604_v63 = vpop.xlane.xlu0 %603 }
 0x383   :  { %3396 = vrcp.f32 %v604_v63 }
 0x384   :  { %3398 = vrcp.f32 %v601_v58 }
 0x385   :  { %3400 = vrcp.f32 %v610_v57  ;;  %v3393_v5 = vpop.eup %3392 }
 0x386   :  { %v3359_v0 = vpop.permute.xlu0 %3358  ;;  %v613_v19 = vpop.xlane.xlu1 %612  ;;  %v624_v12 = vmul.f32 %v3393_v5, %v3381_v46 }
 0x387   :  { %v3361_v1 = vunpack.i.h.bf16 %v3359_v0  ;;  %v3360_v2 = vunpack.i.l.bf16 %v3359_v0  ;;  %3402 = vrcp.f32 %v613_v19  ;;  %v2686_v0 = vld [vmem:[%s4119_s7] ss:$0 sm:$0xff] }
 0x389   :  { %v3187_v3 = vpack.c.bf16 %v3361_v1, %v3360_v2  ;;  %v3395_v6 = vpop.eup %3394 }
 0x38a   :  { %v627_v15 = vmul.f32 %v3395_v6, %v3383_v49 }
 0x38b   :  { %3188 = vmatprep.subr.bf16.mxu1 %v3187_v3  ;;  %3196 = vmatprep.subr.bf16.mxu0 %v3187_v3 }
 0x38c   :  { %3190 = vmatpush3.bf16.msra.mxu1 %v3187_v3  ;;  %3198 = vmatpush3.bf16.msra.mxu0 %v3187_v3 }
 0x38d   :  { %v3397_v7 = vpop.eup %3396  ;;  %3192 = vmatprep.subr.bf16.mxu1 %v3187_v3  ;;  %3204 = vmatprep.subr.bf16.mxu0 %v3203_v26 }
 0x38e   :  { %v3399_v10 = vpop.eup %3398  ;;  %v626_v13 = vmul.f32 %v3397_v7, %v3385_v51 }
 0x38f   :  { %v3401_v14 = vpop.eup %3400  ;;  %2951 = vmatmul.mubr.msk.f32.vlgmr.msra.gmra.mrb[8].mxu1 %vm541_vm2, %v623_v9  ;;  %v625_v18 = vmul.f32 %v3399_v10, %v3702_v40 }
 0x390   :  { %3194 = vmatpush3.bf16.msra.mxu1 %v3187_v3  ;;  %2957 = vmatprep.mubr.msk.f32.mxu1 %vm541_vm2, %v624_v12  ;;  %v628_v21 = vmul.f32 %v3401_v14, %v3697_v33 }
 0x391   :  { %2964 = vmatprep.mubr.msk.f32.mxu0 %vm541_vm2, %v626_v13  ;;  %3200 = vmatprep.subr.bf16.mxu1 %v3187_v3  ;;  %v3403_v20 = vpop.eup %3402 }
 0x392   :  { %2965 = vmatmul.mubr.msk.f32.vlgmr.msra.gmra.mrb[2].mxu0 %vm541_vm2, %v627_v15  ;;  %v629_v22 = vmul.f32 %v3403_v20, %v3387_v53 }
 0x393   :  { %2958 = vmatmul.mubr.msk.f32.vlgmr.msra.gmra.mrb[10].mxu1 %vm541_vm2, %v625_v18  ;;  %3206 = vmatpush3.bf16.msra.mxu0 %v3203_v26  ;;  %v1124_v26 = vld [vmem:[%s4122_s10 + $0x18] sm:$0xff] }
 0x394   :  { %3202 = vmatpush3.bf16.msra.mxu1 %v3187_v3  ;;  %2971 = vmatprep.mubr.msk.f32.mxu1 %vm541_vm2, %v628_v21  ;;  %v1121_v21 = vld [vmem:[%s4122_s10] sm:$0xff]  ;;  %v3215_v28 = vpack.c.bf16 %v1124_v26, %v1123_v24 }
 0x395   :  { %3208 = vmatprep.subr.bf16.mxu0 %v3207_v30 }
 0x397   :  { %2972 = vmatmul.mubr.msk.f32.vlgmr.msra.gmra.mrb[12].mxu1 %vm541_vm2, %v629_v22  ;;  %3210 = vmatpush3.bf16.msra.mxu0 %v3207_v30  ;;  %v1122_v22 = vld [vmem:[%s4122_s10 + $0x8] sm:$0xff] }
 0x398   :  { %v3211_v23 = vpack.c.bf16 %v1122_v22, %v1121_v21  ;;  %v1216_v30 = vld [vmem:[%s4124_s12 + $0x8] sm:$0xff] }
 0x39a   :  { %3212 = vmatprep.subr.bf16.mxu1 %v3211_v23 }
 0x39b   :  { %3214 = vmatpush3.bf16.msra.mxu1 %v3211_v23 }
 0x39c   :  { %3216 = vmatprep.subr.bf16.mxu1 %v3215_v28 }
 0x39f   :  { %3218 = vmatpush3.bf16.msra.mxu1 %v3215_v28 }
 0x462   :  { %v2952_v32 = vpop.f32.mrb[8].mxu1 }
 0x463   :  { %v708_v33 = vpop.f32.mrb[9].mxu1  ;;  %v961_v34 = vmul.f32 %v2952_v32, %v3608_v16  ;;  %v1217_v32 = vld [vmem:[%s4124_s12 + $0x10] sm:$0xff] }
 0x464   :  { %v960_v36 = vmul.f32 %v3608_v16, %v708_v33  ;;  %v3219_v33 = vpack.c.bf16 %v1216_v30, %v1215_v29 }
 0x465   :  { %v2966_v35 = vpop.f32.mrb[2].mxu0  ;;  %v975_v46 = vsel %vm77_vm0, %v961_v34, 0.0  ;;  %v1218_v34 = vld [vmem:[%s4124_s12 + $0x18] sm:$0xff] }
 0x466   :  { %v870_v38 = vpop.f32.mrb[3].mxu0  ;;  %v2959_v39 = vpop.f32.mrb[10].mxu1  ;;  %v965_v40 = vmul.f32 %v2966_v35, %v3657_v31  ;;  %v968_v48 = vsel %vm77_vm0, %v960_v36, 0.0  ;;  %v3223_v35 = vpack.c.bf16 %v1218_v34, %v1217_v32  ;;  %v1219_v36 = vld [vmem:[%s4124_s12 + $0x20] sm:$0xff]  ;;  %3220 = vmatprep.subr.bf16.mxu0 %v3219_v33 }
 0x467   :  { %v963_v42 = vmul.f32 %v2959_v39, %v3642_v27  ;;  %v789_v43 = vpop.f32.mrb[11].mxu1  ;;  %v964_v44 = vmul.f32 %v3657_v31, %v870_v38  ;;  %v1220_v38 = vld [vmem:[%s4124_s12 + $0x28] sm:$0xff] }
 0x468   :  { %v962_v45 = vmul.f32 %v3642_v27, %v789_v43  ;;  %v978_v52 = vsel %vm77_vm0, %v965_v40, 0.0  ;;  %v3227_v39 = vpack.c.bf16 %v1220_v38, %v1219_v36  ;;  %v1221_v40 = vld [vmem:[%s4124_s12 + $0x30] sm:$0xff] }
 0x469   :  { %v976_v47 = vsel %vm77_vm0, %v963_v42, 0.0  ;;  %v971_v56 = vsel %vm77_vm0, %v964_v44, 0.0  ;;  %v1222_v42 = vld [vmem:[%s4124_s12 + $0x38] sm:$0xff]  ;;  %v1223_v44 = vld [vmem:[%s4124_s12 + $0x40] sm:$0xff] }
 0x46a   :  { %v977_v49 = vadd.f32 %v976_v47, %v975_v46  ;;  %v969_v50 = vsel %vm77_vm0, %v962_v45, 0.0  ;;  %v2973_v51 = vpop.f32.mrb[12].mxu1  ;;  %v3231_v43 = vpack.c.bf16 %v1222_v42, %v1221_v40  ;;  %v1224_v45 = vld [vmem:[%s4124_s12 + $0x48] sm:$0xff]  ;;  %v1225_v47 = vld [vmem:[%s4124_s12 + $0x50] sm:$0xff]  ;;  %v2697_v40 = vld [vmem:[%s4116_s4 + $0x20] sm:$0xff] }
 0x46b   :  { %v970_v53 = vadd.f32 %v969_v50, %v968_v48  ;;  %v967_v54 = vmul.f32 %v2973_v51, %v3613_v17  ;;  %v951_v55 = vpop.f32.mrb[13].mxu1  ;;  %v3235_v46 = vpack.c.bf16 %v1224_v45, %v1223_v44  ;;  %v1226_v48 = vld [vmem:[%s4124_s12 + $0x58] sm:$0xff]  ;;  %v1227_v50 = vld [vmem:[%s4124_s12 + $0x60] sm:$0xff]  ;;  %v1228_v51 = vld [vmem:[%s4124_s12 + $0x68] sm:$0xff] }
 0x46c   :  { %v979_v57 = vadd.f32 %v978_v52, %v977_v49  ;;  %v966_v58 = vmul.f32 %v3613_v17, %v951_v55  ;;  %v3239_v49 = vpack.c.bf16 %v1226_v48, %v1225_v47  ;;  %v3243_v52 = vpack.c.bf16 %v1228_v51, %v1227_v50  ;;  %v2698_v42 = vld [vmem:[%s4116_s4 + $0x28] sm:$0xff]  ;;  %v2699_v44 = vld [vmem:[%s4116_s4 + $0x30] sm:$0xff]  ;;  %v2700_v45 = vld [vmem:[%s4116_s4 + $0x38] sm:$0xff] }
 0x46d   :  { %v980_v59 = vsel %vm77_vm0, %v967_v54, 0.0  ;;  %v972_v60 = vadd.f32 %v971_v56, %v970_v53 }
 0x46e   :  { %v981_v61 = vadd.f32 %v980_v59, %v979_v57  ;;  %v973_v62 = vsel %vm77_vm0, %v966_v58, 0.0 }
 0x46f   :  { %v974_v63 = vadd.f32 %v973_v62, %v972_v60  ;;  %v2689_v60 = vld [vmem:[%s4120_s8] ss:$0 sm:$0xff] }
 0x470   :  { %v2690_v62 = vld [vmem:[%s4121_s9] ss:$0 sm:$0xff] }
 0x471   :  { %2982 = vmatprep.mubr.msk.f32.mxu0 %vm77_vm0, %v974_v63 }
 0x472   :  { %2983 = vmatmul.mubr.msk.f32.vlgmr.msra.gmra.mrb[4].mxu0 %vm77_vm0, %v981_v61 }
 0x473   :  { %3222 = vmatpush3.bf16.msra.mxu0 %v3219_v33 }
 0x474   :  { %3224 = vmatprep.subr.bf16.mxu0 %v3223_v35 }
 0x477   :  { %3226 = vmatpush3.bf16.msra.mxu0 %v3223_v35 }
 0x478   :  { %3228 = vmatprep.subr.bf16.mxu0 %v3227_v39 }
 0x47b   :  { %3230 = vmatpush3.bf16.msra.mxu0 %v3227_v39 }
 0x47c   :  { %3232 = vmatprep.subr.bf16.mxu0 %v3231_v43 }
 0x47f   :  { %3234 = vmatpush3.bf16.msra.mxu0 %v3231_v43  ;;  %v3251_v43 = vpack.c.bf16 %v2698_v42, %v2697_v40 }
 0x480   :  { %3236 = vmatprep.subr.bf16.mxu0 %v3235_v46 }
 0x481   :  { %3252 = vmatprep.subr.bf16.mxu1 %v3251_v43 }
 0x483   :  { %3238 = vmatpush3.bf16.msra.mxu0 %v3235_v46  ;;  %v3255_v46 = vpack.c.bf16 %v2700_v45, %v2699_v44 }
 0x484   :  { %3240 = vmatprep.subr.bf16.mxu0 %v3239_v49 }
 0x487   :  { %3242 = vmatpush3.bf16.msra.mxu0 %v3239_v49 }
 0x488   :  { %3244 = vmatprep.subr.bf16.mxu0 %v3243_v52 }
 0x48b   :  { %3246 = vmatpush3.bf16.msra.mxu0 %v3243_v52 }
 0x545   :  { %v2984_v19 = vpop.f32.mrb[4].mxu0 }
 0x546   :  { %v1065_v1 = vpop.f32.mrb[5].mxu0  ;;  %v1071_v2 = vadd.f32 %v2984_v19, %v2686_v0 }
 0x547   :  { %v1066_v3 = vadd.f32 %v2686_v0, %v1065_v1 }
 0x548   :  { %v1075_v6 = vadd.f32 %v1071_v2, %v3598_v11 }
 0x549   :  { %v1074_v4 = vadd.f32 %v1066_v3, %v3588_v8 }
 0x54a   :  { %v1081_v7 = vsel %vm77_vm0, %v1075_v6, 0.0 }
 0x54b   :  { %v1078_v5 = vsel %vm77_vm0, %v1074_v4, 0.0 }
 0x54c   :  { %1079 = vadd.xlane.f32.xlu1 %v1078_v5  ;;  %v1230_v5 = vld [vmem:[%s4124_s12 + $0x78] sm:$0xff] }
 0x550   :  { %1082 = vadd.xlane.f32.xlu1 %v1081_v7  ;;  %v2691_v7 = vld [vmem:[%s4123_s11] ss:$0 sm:$0xff] }
 0x5d9   :  { %v1080_v9 = vpop.xlane.xlu1 %1079 }
 0x5da   :  { %v1085_v10 = vmul.f32 0.03125, %v1080_v9 }
 0x5dc   :  { %v3760_v12 = vsub.f32 %v1074_v4, %v1085_v10  ;;  %v1229_v4 = vld [vmem:[%s4124_s12 + $0x70] sm:$0xff] }
 0x5dd   :  { %v1083_v13 = vpop.xlane.xlu1 %1082 }
 0x5de   :  { %v1086_v14 = vmul.f32 0.03125, %v1083_v13  ;;  %v1089_v15 = vmul.f32 %v3760_v12, %v3760_v12 }
 0x5e0   :  { %v3764_v18 = vsub.f32 %v1075_v6, %v1086_v14  ;;  %v1091_v8 = vsel %vm77_vm0, %v1089_v15, 0.0  ;;  %v3247_v6 = vpack.c.bf16 %v1230_v5, %v1229_v4 }
 0x5e1   :  { %1092 = vadd.xlane.f32.xlu1 %v1091_v8 }
 0x5e2   :  { %v1090_v11 = vmul.f32 %v3764_v18, %v3764_v18  ;;  %3248 = vmatprep.subr.bf16.mxu0 %v3247_v6 }
 0x5e3   :  { %3250 = vmatpush3.bf16.msra.mxu0 %v3247_v6 }
 0x5e4   :  { %v1094_v20 = vsel %vm77_vm0, %v1090_v11, 0.0 }
 0x5e5   :  { %1095 = vadd.xlane.f32.xlu1 %v1094_v20 }
 0x66e   :  { %v1093_v53 = vpop.xlane.xlu1 %1092 }
 0x66f   :  { %v1097_v54 = vmul.f32 0.03125, %v1093_v53 }
 0x671   :  { %v1099_v55 = vadd.f32 1e-05, %v1097_v54  ;;  %v2695_v54 = vld [vmem:[%s4126_s14] ss:$0 sm:$0xff] }
 0x672   :  { %v1096_v56 = vpop.xlane.xlu1 %1095 }
 0x673   :  { %3404 = vrsqrt.f32 %v1099_v55  ;;  %v1098_v57 = vmul.f32 0.03125, %v1096_v56  ;;  %v2696_v56 = vld [vmem:[%s4127_s15] ss:$0 sm:$0xff] }
 0x675   :  { %v1100_v58 = vadd.f32 1e-05, %v1098_v57 }
 0x677   :  { %3406 = vrsqrt.f32 %v1100_v58 }
 0x67d   :  { %v3405_v59 = vpop.eup %3404 }
 0x67e   :  { %v1103_v61 = vmul.f32 %v3405_v59, %v3760_v12 }
 0x680   :  { %v1111_v63 = vmul.f32 %v2689_v60, %v1103_v61 }
 0x681   :  { %v3407_v0 = vpop.eup %3406 }
 0x682   :  { %v1104_v19 = vmul.f32 %v3407_v0, %v3764_v18  ;;  %v1119_v1 = vadd.f32 %v2690_v62, %v1111_v63  ;;  %v2694_v18 = vld [vmem:[%s4125_s13] ss:$0 sm:$0xff]  ;;  %v2702_v63 = vld [vmem:[%s4117_s5 + $0x1] ss:$0 sm:$0xff] }
 0x684   :  { %v1112_v2 = vmul.f32 %v2689_v60, %v1104_v19  ;;  %2993 = vmatprep.mubr.msk.f32.mxu1 %vm77_vm0, %v1119_v1 }
 0x686   :  { %v1120_v3 = vadd.f32 %v2690_v62, %v1112_v2 }
 0x688   :  { %2994 = vmatmul.mubr.msk.f32.vlgmr.msra.gmra.mrb[14].mxu1 %vm77_vm0, %v1120_v3 }
 0x689   :  { %3254 = vmatpush3.bf16.msra.mxu1 %v3251_v43 }
 0x68a   :  { %3256 = vmatprep.subr.bf16.mxu1 %v3255_v46 }
 0x68d   :  { %3258 = vmatpush3.bf16.msra.mxu1 %v3255_v46 }
 0x75b   :  { %v2995_v9 = vpop.f32.mrb[14].mxu1 }
 0x75c   :  { %v1210_v10 = vadd.f32 %v2995_v9, %v2691_v7  ;;  %v1204_v12 = vpop.f32.mrb[15].mxu1 }
 0x75d   :  { %v1205_v13 = vadd.f32 %v2691_v7, %v1204_v12 }
 0x75e   :  { %v1214_v15 = vmax.f32 %v1210_v10, 0.0 }
 0x75f   :  { %v1213_v14 = vmax.f32 %v1205_v13, 0.0 }
 0x761   :  { %3028 = vmatprep.mubr.f32.mxu0 %v1213_v14 }
 0x762   :  { %3029 = vmatmul.mubr.f32.vlgmr.msra.gmra.mrb[6].mxu0 %v1214_v15 }
 0x835   :  { %v3030_v8 = vpop.f32.mrb[6].mxu0 }
 0x836   :  { %v1304_v11 = vpop.f32.mrb[7].mxu0  ;;  %v1310_v20 = vadd.f32 %v3030_v8, %v2694_v18 }
 0x837   :  { %v1305_v21 = vadd.f32 %v2694_v18, %v1304_v11 }
 0x838   :  { %v1314_v24 = vadd.f32 %v1310_v20, %v1120_v3 }
 0x839   :  { %v1313_v22 = vadd.f32 %v1305_v21, %v1119_v1 }
 0x83a   :  { %v1320_v26 = vsel %vm77_vm0, %v1314_v24, 0.0 }
 0x83b   :  { %v1317_v23 = vsel %vm77_vm0, %v1313_v22, 0.0 }
 0x83c   :  { %1318 = vadd.xlane.f32.xlu1 %v1317_v23 }
 0x840   :  { %1321 = vadd.xlane.f32.xlu1 %v1320_v26 }
 0x8c9   :  { %v1319_v28 = vpop.xlane.xlu1 %1318 }
 0x8ca   :  { %v1323_v29 = vmul.f32 0.03125, %v1319_v28 }
 0x8cc   :  { %v1325_v30 = vsub.f32 %v1313_v22, %v1323_v29 }
 0x8cd   :  { %v1322_v32 = vpop.xlane.xlu1 %1321 }
 0x8ce   :  { %v1324_v33 = vmul.f32 0.03125, %v1322_v32  ;;  %v1327_v34 = vmul.f32 %v1325_v30, %v1325_v30 }
 0x8d0   :  { %v1326_v35 = vsub.f32 %v1314_v24, %v1324_v33  ;;  %v1329_v36 = vsel %vm77_vm0, %v1327_v34, 0.0 }
 0x8d1   :  { %1330 = vadd.xlane.f32.xlu0 %v1329_v36 }
 0x8d2   :  { %v1328_v38 = vmul.f32 %v1326_v35, %v1326_v35 }
 0x8d4   :  { %v1332_v39 = vsel %vm77_vm0, %v1328_v38, 0.0 }
 0x8d5   :  { %1333 = vadd.xlane.f32.xlu1 %v1332_v39 }
 0x95e   :  { %v1331_v47 = vpop.xlane.xlu0 %1330 }
 0x95f   :  { %v1335_v48 = vmul.f32 0.03125, %v1331_v47 }
 0x961   :  { %v1337_v49 = vadd.f32 1e-05, %v1335_v48 }
 0x962   :  { %v1334_v50 = vpop.xlane.xlu1 %1333 }
 0x963   :  { %3408 = vrsqrt.f32 %v1337_v49  ;;  %v1336_v51 = vmul.f32 0.03125, %v1334_v50 }
 0x965   :  { %v1338_v52 = vadd.f32 1e-05, %v1336_v51 }
 0x967   :  { %3410 = vrsqrt.f32 %v1338_v52 }
 0x96d   :  { %v3409_v53 = vpop.eup %3408 }
 0x96e   :  { %v1341_v55 = vmul.f32 %v3409_v53, %v1325_v30 }
 0x970   :  { %v1349_v57 = vmul.f32 %v2695_v54, %v1341_v55 }
 0x971   :  { %v3411_v58 = vpop.eup %3410 }
 0x972   :  { %v1342_v59 = vmul.f32 %v3411_v58, %v1326_v35  ;;  %v3868_v60 = vadd.f32 %v2696_v56, %v1349_v57 }
 0x974   :  { %v1350_v61 = vmul.f32 %v2695_v54, %v1342_v59  ;;  %3039 = vmatprep.mubr.msk.f32.mxu1 %vm77_vm0, %v3868_v60 }
 0x976   :  { %v3872_v62 = vadd.f32 %v2696_v56, %v1350_v61 }
 0x978   :  { %3040 = vmatmul.mubr.msk.f32.vlgmr.msra.gmra.mrb[16].mxu1 %vm77_vm0, %v3872_v62 }
 0xa4b   :  { %v3041_v0 = vpop.f32.mrb[16].mxu1 }
 0xa4c   :  { %v1450_v19 = vadd.f32 %v3041_v0, %v2702_v63  ;;  %v1444_v1 = vpop.f32.mrb[17].mxu1 }
 0xa4d   :  { %v1445_v2 = vadd.f32 %v2702_v63, %v1444_v1 }
 0xa4e   :  { %v1454_v12 = vmul.f32 %v3608_v16, %v1450_v19  ;;  %v1460_v13 = vmul.f32 %v3613_v17, %v1450_v19  ;;  %v1456_v15 = vmul.f32 %v3642_v27, %v1450_v19 }
 0xa4f   :  { %v3879_v3 = vpack.i.bf16 %v1450_v19, %v1445_v2  ;;  %v1453_v4 = vmul.f32 %v3608_v16, %v1445_v2  ;;  %v1459_v5 = vmul.f32 %v3613_v17, %v1445_v2  ;;  %v1455_v14 = vmul.f32 %v3642_v27, %v1445_v2 }
 0xa50   :  { %v1457_v16 = vmul.f32 %v3657_v31, %v1445_v2  ;;  %v1458_v17 = vmul.f32 %v3657_v31, %v1450_v19 }
 0xa51   :  { %3363 = vrot.lane.b32.xlu1 %v3879_v3, %s3480_s28  ;;  %3046 = vmatprep.mubr.msk.f32.mxu1 %vm77_vm0, %v1453_v4 }
 0xa52   :  { %3067 = vmatprep.mubr.msk.f32.mxu0 %vm77_vm0, %v1459_v5 }
 0xac3   :  { %v3364_v6 = vpop.permute.xlu1 %3363 }
 0xac4   :  { %v3366_v7 = vunpack.i.h.bf16 %v3364_v6  ;;  %v3365_v9 = vunpack.i.l.bf16 %v3364_v6 }
 0xac6   :  { %v3259_v10 = vpack.c.bf16 %v3366_v7, %v3365_v9 }
 0xac8   :  { %3261 = vmatprep.subr.msk.bf16.mxu1 %vm3625_vm1, %v3259_v10  ;;  %3279 = vmatprep.subr.msk.bf16.mxu0 %vm3625_vm1, %v3259_v10 }
 0xac9   :  { %3264 = vmatpush3.bf16.xpose.msk.msra.mxu1 %vm3625_vm1, %v3259_v10  ;;  %3282 = vmatpush3.bf16.xpose.msk.msra.mxu0 %vm3625_vm1, %v3259_v10 }
 0xaca   :  { %3267 = vmatprep.subr.msk.bf16.mxu1 %vm3625_vm1, %v3259_v10 }
 0xad0   :  { %3047 = vmatmul.mubr.msk.f32.vlgmr.msra.gmra.mrb[18].mxu1 %vm77_vm0, %v1454_v12  ;;  %3068 = vmatmul.mubr.msk.f32.vlgmr.msra.gmra.mrb[8].mxu0 %vm77_vm0, %v1460_v13 }
 0xad1   :  { %3270 = vmatpush3.bf16.xpose.msk.msra.mxu1 %vm3625_vm1, %v3259_v10  ;;  %3053 = vmatprep.mubr.msk.f32.mxu1 %vm77_vm0, %v1455_v14 }
 0xad2   :  { %3273 = vmatprep.subr.msk.bf16.mxu1 %vm3625_vm1, %v3259_v10 }
 0xad8   :  { %3054 = vmatmul.mubr.msk.f32.vlgmr.msra.gmra.mrb[20].mxu1 %vm77_vm0, %v1456_v15 }
 0xad9   :  { %3276 = vmatpush3.bf16.xpose.msk.msra.mxu1 %vm3625_vm1, %v3259_v10  ;;  %3060 = vmatprep.mubr.msk.f32.mxu1 %vm77_vm0, %v1457_v16 }
 0xae0   :  { %3061 = vmatmul.mubr.msk.f32.vlgmr.msra.gmra.mrb[22].mxu1 %vm77_vm0, %v1458_v17 }
 0xba3   :  { %v3048_v18 = vpop.f32.mrb[18].mxu1  ;;  %v3069_v8 = vpop.f32.mrb[8].mxu0 }
 0xba4   :  { %v1796_v11 = vmul.f32 0.35355338, %v3048_v18  ;;  %v1543_v20 = vpop.f32.mrb[19].mxu1  ;;  %v1786_v21 = vpop.f32.mrb[9].mxu0  ;;  %v1802_v45 = vmul.f32 0.35355338, %v3069_v8 }
 0xba5   :  { %v1795_v22 = vmul.f32 0.35355338, %v1543_v20  ;;  %v1801_v27 = vmul.f32 0.35355338, %v1786_v21 }
 0xba6   :  { %v1804_v23 = vadd.f32 %v1796_v11, %v3670_v37  ;;  %v1810_v49 = vadd.f32 %v1802_v45, %v3670_v37 }
 0xba7   :  { %v1803_v24 = vadd.f32 %v1795_v22, %v3675_v41  ;;  %v1809_v26 = vadd.f32 %v1801_v27, %v3675_v41 }
 0xba8   :  { %v1814_v25 = vsel %vm541_vm2, %v1804_v23, -inf  ;;  %v1832_v50 = vsel %vm541_vm2, %v1810_v49, -inf }
 0xba9   :  { %1815 = vmax.xlane.f32.xlu0 %v1814_v25  ;;  %v1811_v31 = vsel %vm541_vm2, %v1803_v24, -inf  ;;  %v1829_v32 = vsel %vm541_vm2, %v1809_v26, -inf }
 0xbaa   :  { %1812 = vmax.xlane.f32.xlu1 %v1811_v31 }
 0xbab   :  { %v3055_v28 = vpop.f32.mrb[20].mxu1 }
 0xbac   :  { %v1798_v29 = vmul.f32 0.35355338, %v3055_v28  ;;  %v1624_v30 = vpop.f32.mrb[21].mxu1 }
 0xbad   :  { %v1797_v33 = vmul.f32 0.35355338, %v1624_v30  ;;  %1830 = vmax.xlane.f32.xlu0 %v1829_v32 }
 0xbae   :  { %v1806_v34 = vadd.f32 %v1798_v29, %v3670_v37 }
 0xbaf   :  { %v1805_v36 = vadd.f32 %v1797_v33, %v3675_v41 }
 0xbb0   :  { %v1820_v35 = vsel %vm541_vm2, %v1806_v34, -inf }
 0xbb1   :  { %1821 = vmax.xlane.f32.xlu0 %v1820_v35  ;;  %v1817_v42 = vsel %vm541_vm2, %v1805_v36, -inf }
 0xbb3   :  { %v3062_v38 = vpop.f32.mrb[22].mxu1 }
 0xbb4   :  { %v1800_v39 = vmul.f32 0.35355338, %v3062_v38  ;;  %v1705_v40 = vpop.f32.mrb[23].mxu1 }
 0xbb5   :  { %v1799_v43 = vmul.f32 0.35355338, %v1705_v40  ;;  %1818 = vmax.xlane.f32.xlu0 %v1817_v42 }
 0xbb6   :  { %v1808_v44 = vadd.f32 %v1800_v39, %v3670_v37 }
 0xbb7   :  { %v1807_v47 = vadd.f32 %v1799_v43, %v3675_v41 }
 0xbb8   :  { %v1826_v46 = vsel %vm541_vm2, %v1808_v44, -inf }
 0xbb9   :  { %1827 = vmax.xlane.f32.xlu0 %v1826_v46  ;;  %v1823_v48 = vsel %vm541_vm2, %v1807_v47, -inf }
 0xbbd   :  { %1824 = vmax.xlane.f32.xlu0 %v1823_v48 }
 0xbc1   :  { %1833 = vmax.xlane.f32.xlu0 %v1832_v50 }
 0xc36   :  { %v1816_v51 = vpop.xlane.xlu0 %1815 }
 0xc37   :  { %v1836_v52 = vsub.f32 %v1804_v23, %v1816_v51  ;;  %v1813_v53 = vpop.xlane.xlu1 %1812 }
 0xc38   :  { %v1835_v54 = vsub.f32 %v1803_v24, %v1813_v53 }
 0xc39   :  { %v1845_v55 = vmul.f32 1.442695, %v1836_v52 }
 0xc3a   :  { %v1843_v56 = vmul.f32 1.442695, %v1835_v54  ;;  %v1831_v57 = vpop.xlane.xlu0 %1830 }
 0xc3b   :  { %3412 = vpow2.f32 %v1845_v55  ;;  %v1841_v58 = vsub.f32 %v1809_v26, %v1831_v57  ;;  %v2729_v57 = vld [vmem:[%s4118_s6 + $0x20] sm:$0xff] }
 0xc3c   :  { %3414 = vpow2.f32 %v1843_v56 }
 0xc3d   :  { %v1855_v41 = vmul.f32 1.442695, %v1841_v58  ;;  %v2730_v58 = vld [vmem:[%s4118_s6 + $0x28] sm:$0xff] }
 0xc3e   :  { %v1822_v59 = vpop.xlane.xlu0 %1821 }
 0xc3f   :  { %3416 = vpow2.f32 %v1855_v41  ;;  %v1838_v61 = vsub.f32 %v1806_v34, %v1822_v59  ;;  %v3299_v41 = vpack.c.bf16 %v2730_v58, %v2729_v57  ;;  %v2731_v59 = vld [vmem:[%s4118_s6 + $0x30] sm:$0xff]  ;;  %v2749_v58 = vld [vmem:[%s4124_s12 + $0x80] sm:$0xff] }
 0xc41   :  { %v1849_v63 = vmul.f32 1.442695, %v1838_v61  ;;  %v2732_v61 = vld [vmem:[%s4118_s6 + $0x38] sm:$0xff] }
 0xc42   :  { %v1819_v37 = vpop.xlane.xlu0 %1818 }
 0xc43   :  { %3418 = vpow2.f32 %v1849_v63  ;;  %v1837_v0 = vsub.f32 %v1805_v36, %v1819_v37  ;;  %v3303_v63 = vpack.c.bf16 %v2732_v61, %v2731_v59  ;;  %v2751_v59 = vld [vmem:[%s4124_s12 + $0x90] sm:$0xff] }
 0xc45   :  { %v3931_v19 = vpop.eup %3412  ;;  %v1847_v1 = vmul.f32 1.442695, %v1837_v0 }
 0xc46   :  { %v3415_v2 = vpop.eup %3414  ;;  %v1828_v4 = vpop.xlane.xlu0 %1827  ;;  %v1862_v5 = vsel %vm541_vm2, %v3931_v19, 0.0 }
 0xc47   :  { %3420 = vpow2.f32 %v1847_v1  ;;  %v1840_v6 = vsub.f32 %v1808_v44, %v1828_v4  ;;  %1863 = vadd.xlane.f32.xlu1 %v1862_v5  ;;  %v1859_v7 = vsel %vm541_vm2, %v3415_v2, 0.0 }
 0xc48   :  { %1860 = vadd.xlane.f32.xlu0 %v1859_v7  ;;  %v3453_v7 = vld [vmem:[%s4114_s2 + $0x2] ss:$0 sm:$0xff] }
 0xc49   :  { %v3936_v9 = vpop.eup %3416  ;;  %v1853_v10 = vmul.f32 1.442695, %v1840_v6 }
 0xc4a   :  { %v1825_v12 = vpop.xlane.xlu0 %1824  ;;  %v1877_v13 = vsel %vm541_vm2, %v3936_v9, 0.0 }
 0xc4b   :  { %3422 = vpow2.f32 %v1853_v10  ;;  %v1839_v14 = vsub.f32 %v1807_v47, %v1825_v12  ;;  %v3454_v10 = vld [vmem:[%s4114_s2 + $0x1] ss:$0 sm:$0xff] }
 0xc4c   :  { %1878 = vadd.xlane.f32.xlu0 %v1877_v13 }
 0xc4d   :  { %v3940_v15 = vpop.eup %3418  ;;  %v1851_v16 = vmul.f32 1.442695, %v1839_v14 }
 0xc4e   :  { %v1834_v17 = vpop.xlane.xlu0 %1833  ;;  %v1868_v18 = vsel %vm541_vm2, %v3940_v15, 0.0 }
 0xc4f   :  { %3424 = vpow2.f32 %v1851_v16  ;;  %v1842_v8 = vsub.f32 %v1810_v49, %v1834_v17  ;;  %1869 = vadd.xlane.f32.xlu1 %v1868_v18 }
 0xc51   :  { %v3421_v11 = vpop.eup %3420  ;;  %v1857_v20 = vmul.f32 1.442695, %v1842_v8 }
 0xc52   :  { %v1865_v21 = vsel %vm541_vm2, %v3421_v11, 0.0 }
 0xc53   :  { %3426 = vpow2.f32 %v1857_v20  ;;  %1866 = vadd.xlane.f32.xlu0 %v1865_v21 }
 0xc55   :  { %v3423_v22 = vpop.eup %3422 }
 0xc56   :  { %v1874_v27 = vsel %vm541_vm2, %v3423_v22, 0.0 }
 0xc57   :  { %1875 = vadd.xlane.f32.xlu1 %v1874_v27  ;;  %v3455_v27 = vld [vmem:[%s4114_s2 + $0x3] ss:$0 sm:$0xff] }
 0xc59   :  { %v3425_v23 = vpop.eup %3424 }
 0xc5a   :  { %v1871_v24 = vsel %vm541_vm2, %v3425_v23, 0.0 }
 0xc5b   :  { %1872 = vadd.xlane.f32.xlu0 %v1871_v24 }
 0xc5d   :  { %v3427_v25 = vpop.eup %3426 }
 0xc5e   :  { %v1880_v26 = vsel %vm541_vm2, %v3427_v25, 0.0 }
 0xc5f   :  { %1881 = vadd.xlane.f32.xlu1 %v1880_v26 }
 0xc71   :  { %3368 = vrot.lane.b32.xlu0 %v3879_v3, %s3481_s3 }
 0xcd4   :  { %v1864_v28 = vpop.xlane.xlu1 %1863 }
 0xcd5   :  { %v1861_v31 = vpop.xlane.xlu0 %1860 }
 0xcd6   :  { %3428 = vrcp.f32 %v1861_v31 }
 0xcd7   :  { %3430 = vrcp.f32 %v1864_v28 }
 0xcd9   :  { %v1879_v30 = vpop.xlane.xlu0 %1878 }
 0xcdc   :  { %v1870_v32 = vpop.xlane.xlu1 %1869 }
 0xce0   :  { %v3429_v29 = vpop.eup %3428  ;;  %v1867_v34 = vpop.xlane.xlu0 %1866 }
 0xce1   :  { %v1891_v33 = vmul.f32 %v3429_v29, %v3415_v2  ;;  %3432 = vrcp.f32 %v1867_v34  ;;  %v3431_v43 = vpop.eup %3430  ;;  %v2734_v34 = vld [vmem:[%s4119_s7 + $0x1] ss:$0 sm:$0xff]  ;;  %s3482_s7 = smov [#allocation2]  }
 0xce2   :  { %v1892_v47 = vmul.f32 %v3431_v43, %v3931_v19  ;;  %v3452_v19 = vld [vmem:[%s4114_s2] ss:$0 sm:$0xff]  ;;  %s2644_s4 = sshll.u32 %s3482_s7, 4  ;;  %s2645_s4 = int_to_ptr.vmem [resolvable:$true] %s2644_s4 }
 0xce3   :  { %3074 = vmatprep.mubr.msk.f32.mxu1 %vm541_vm2, %v1891_v33  ;;  %s3456_s17 = scalar_lea.vmem %s2645_s4, 256  ;;  %p3461_p1 = scmp.lt.s32.totalorder %s2645_s4, %s2645_s4 }
 0xce4   :  { %v1876_v35 = vpop.xlane.xlu1 %1875  ;;  %p3457_p0 = scmp.ne.s32.totalorder %s2645_s4, %s3456_s17  ;;  %p3462_p2 = scmp.lt.s32.totalorder %s3456_s17, %s3456_s17 }
 0xce5   :  { %3434 = vrcp.f32 %v1876_v35 }
 0xce6   :  { %p3463_p3 = por %p3462_p2, %p3461_p1 }
 0xce8   :  { %v1873_v36 = vpop.xlane.xlu0 %1872  ;;  %p3464_p4 = pnand %p3463_p3, %p3457_p0 }
 0xce9   :  { %3436 = vrcp.f32 %v1873_v36 }
 0xcea   :  { %3438 = vrcp.f32 %v1870_v32 }
 0xceb   :  { %3440 = vrcp.f32 %v1879_v30  ;;  %v3433_v44 = vpop.eup %3432 }
 0xcec   :  { %v1882_v38 = vpop.xlane.xlu1 %1881  ;;  %v3369_v3 = vpop.permute.xlu0 %3368  ;;  %v1893_v49 = vmul.f32 %v3433_v44, %v3421_v11 }
 0xced   :  { %v3371_v39 = vunpack.i.h.bf16 %v3369_v3  ;;  %v3370_v40 = vunpack.i.l.bf16 %v3369_v3  ;;  %3442 = vrcp.f32 %v1882_v38 }
 0xcef   :  { %v3283_v42 = vpack.c.bf16 %v3371_v39, %v3370_v40  ;;  %v3435_v45 = vpop.eup %3434 }
 0xcf0   :  { %v1896_v52 = vmul.f32 %v3435_v45, %v3423_v22 }
 0xcf1   :  { %3284 = vmatprep.subr.bf16.mxu1 %v3283_v42  ;;  %3292 = vmatprep.subr.bf16.mxu0 %v3283_v42 }
 0xcf2   :  { %3286 = vmatpush3.bf16.msra.mxu1 %v3283_v42  ;;  %3294 = vmatpush3.bf16.msra.mxu0 %v3283_v42 }
 0xcf3   :  { %v3437_v46 = vpop.eup %3436  ;;  %3288 = vmatprep.subr.bf16.mxu1 %v3283_v42  ;;  %3300 = vmatprep.subr.bf16.mxu0 %v3299_v41 }
 0xcf4   :  { %v3439_v48 = vpop.eup %3438  ;;  %v1895_v50 = vmul.f32 %v3437_v46, %v3425_v23 }
 0xcf5   :  { %v3441_v51 = vpop.eup %3440  ;;  %3075 = vmatmul.mubr.msk.f32.vlgmr.msra.gmra.mrb[24].mxu1 %vm541_vm2, %v1892_v47  ;;  %v1894_v53 = vmul.f32 %v3439_v48, %v3940_v15 }
 0xcf6   :  { %3290 = vmatpush3.bf16.msra.mxu1 %v3283_v42  ;;  %3081 = vmatprep.mubr.msk.f32.mxu1 %vm541_vm2, %v1893_v49  ;;  %v1897_v55 = vmul.f32 %v3441_v51, %v3936_v9 }
 0xcf7   :  { %3088 = vmatprep.mubr.msk.f32.mxu0 %vm541_vm2, %v1895_v50  ;;  %3296 = vmatprep.subr.bf16.mxu1 %v3283_v42  ;;  %v3443_v54 = vpop.eup %3442 }
 0xcf8   :  { %3089 = vmatmul.mubr.msk.f32.vlgmr.msra.gmra.mrb[10].mxu0 %vm541_vm2, %v1896_v52  ;;  %v1898_v56 = vmul.f32 %v3443_v54, %v3427_v25  ;;  %v2741_v52 = vld [vmem:[%s4122_s10 + $0x20] sm:$0xff] }
 0xcf9   :  { %3082 = vmatmul.mubr.msk.f32.vlgmr.msra.gmra.mrb[26].mxu1 %vm541_vm2, %v1894_v53  ;;  %3302 = vmatpush3.bf16.msra.mxu0 %v3299_v41  ;;  %v2742_v53 = vld [vmem:[%s4122_s10 + $0x28] sm:$0xff] }
 0xcfa   :  { %3298 = vmatpush3.bf16.msra.mxu1 %v3283_v42  ;;  %3095 = vmatprep.mubr.msk.f32.mxu1 %vm541_vm2, %v1897_v55  ;;  %v3307_v54 = vpack.c.bf16 %v2742_v53, %v2741_v52  ;;  %v2743_v55 = vld [vmem:[%s4122_s10 + $0x30] sm:$0xff]  ;;  %v2750_v41 = vld [vmem:[%s4124_s12 + $0x88] sm:$0xff] }
 0xcfb   :  { %3304 = vmatprep.subr.bf16.mxu0 %v3303_v63  ;;  %v3315_v61 = vpack.c.bf16 %v2750_v41, %v2749_v58 }
 0xcfc   :  { %3308 = vmatprep.subr.bf16.mxu1 %v3307_v54 }
 0xcfd   :  { %3096 = vmatmul.mubr.msk.f32.vlgmr.msra.gmra.mrb[28].mxu1 %vm541_vm2, %v1898_v56  ;;  %3306 = vmatpush3.bf16.msra.mxu0 %v3303_v63  ;;  %v2744_v56 = vld [vmem:[%s4122_s10 + $0x38] sm:$0xff] }
 0xcfe   :  { %3310 = vmatpush3.bf16.msra.mxu1 %v3307_v54  ;;  %v3311_v57 = vpack.c.bf16 %v2744_v56, %v2743_v55  ;;  %v2752_v63 = vld [vmem:[%s4124_s12 + $0x98] sm:$0xff]  ;;  %3316 = vmatprep.subr.bf16.mxu0 %v3315_v61 }
 0xd00   :  { %3312 = vmatprep.subr.bf16.mxu1 %v3311_v57 }
 0xd02   :  { %3314 = vmatpush3.bf16.msra.mxu1 %v3311_v57 }
 0xdc8   :  { %v3076_v37 = vpop.f32.mrb[24].mxu1 }
 0xdc9   :  { %v1977_v0 = vpop.f32.mrb[25].mxu1  ;;  %v2230_v1 = vmul.f32 %v3452_v19, %v3076_v37  ;;  %v3319_v37 = vpack.c.bf16 %v2752_v63, %v2751_v59 }
 0xdca   :  { %v2229_v4 = vmul.f32 %v3452_v19, %v1977_v0  ;;  %v2753_v0 = vld [vmem:[%s4124_s12 + $0xa0] sm:$0xff]  ;;  %v2754_v19 = vld [vmem:[%s4124_s12 + $0xa8] sm:$0xff] }
 0xdcb   :  { %v3090_v2 = vpop.f32.mrb[10].mxu0  ;;  %v2244_v16 = vsel %vm77_vm0, %v2230_v1, 0.0  ;;  %v3323_v1 = vpack.c.bf16 %v2754_v19, %v2753_v0 }
 0xdcc   :  { %v2139_v5 = vpop.f32.mrb[11].mxu0  ;;  %v3083_v6 = vpop.f32.mrb[26].mxu1  ;;  %v2234_v9 = vmul.f32 %v3453_v7, %v3090_v2  ;;  %v2237_v18 = vsel %vm77_vm0, %v2229_v4, 0.0  ;;  %v2755_v2 = vld [vmem:[%s4124_s12 + $0xb0] sm:$0xff]  ;;  %v2756_v4 = vld [vmem:[%s4124_s12 + $0xb8] sm:$0xff] }
 0xdcd   :  { %v2232_v12 = vmul.f32 %v3454_v10, %v3083_v6  ;;  %v2058_v13 = vpop.f32.mrb[27].mxu1  ;;  %v2233_v14 = vmul.f32 %v3453_v7, %v2139_v5  ;;  %v3327_v5 = vpack.c.bf16 %v2756_v4, %v2755_v2  ;;  %v2757_v6 = vld [vmem:[%s4124_s12 + $0xc0] sm:$0xff]  ;;  %v2758_v7 = vld [vmem:[%s4124_s12 + $0xc8] sm:$0xff] }
 0xdce   :  { %v2231_v15 = vmul.f32 %v3454_v10, %v2058_v13  ;;  %v2247_v21 = vsel %vm77_vm0, %v2234_v9, 0.0  ;;  %v3331_v9 = vpack.c.bf16 %v2758_v7, %v2757_v6  ;;  %v2759_v10 = vld [vmem:[%s4124_s12 + $0xd0] sm:$0xff]  ;;  %v2769_v2 = vld [vmem:[%s4126_s14 + $0x1] ss:$0 sm:$0xff] }
 0xdcf   :  { %v2245_v17 = vsel %vm77_vm0, %v2232_v12, 0.0  ;;  %v2240_v25 = vsel %vm77_vm0, %v2233_v14, 0.0  ;;  %v2760_v12 = vld [vmem:[%s4124_s12 + $0xd8] sm:$0xff]  ;;  %v2761_v14 = vld [vmem:[%s4124_s12 + $0xe0] sm:$0xff] }
 0xdd0   :  { %v2246_v8 = vadd.f32 %v2245_v17, %v2244_v16  ;;  %v2238_v11 = vsel %vm77_vm0, %v2231_v15, 0.0  ;;  %v3097_v20 = vpop.f32.mrb[28].mxu1  ;;  %v3335_v13 = vpack.c.bf16 %v2760_v12, %v2759_v10  ;;  %v2762_v15 = vld [vmem:[%s4124_s12 + $0xe8] sm:$0xff] }
 0xdd1   :  { %v2239_v22 = vadd.f32 %v2238_v11, %v2237_v18  ;;  %v2236_v23 = vmul.f32 %v3455_v27, %v3097_v20  ;;  %v2220_v24 = vpop.f32.mrb[29].mxu1  ;;  %v3339_v16 = vpack.c.bf16 %v2762_v15, %v2761_v14 }
 0xdd2   :  { %v2248_v26 = vadd.f32 %v2247_v21, %v2246_v8  ;;  %v2235_v31 = vmul.f32 %v3455_v27, %v2220_v24  ;;  %v2739_v27 = vld [vmem:[%s4120_s8 + $0x1] ss:$0 sm:$0xff] }
 0xdd3   :  { %v2249_v28 = vsel %vm77_vm0, %v2236_v23, 0.0  ;;  %v2241_v29 = vadd.f32 %v2240_v25, %v2239_v22  ;;  %v2740_v24 = vld [vmem:[%s4121_s9 + $0x1] ss:$0 sm:$0xff] }
 0xdd4   :  { %v2250_v30 = vadd.f32 %v2249_v28, %v2248_v26  ;;  %v2242_v32 = vsel %vm77_vm0, %v2235_v31, 0.0 }
 0xdd5   :  { %v2243_v33 = vadd.f32 %v2242_v32, %v2241_v29  ;;  %v2763_v32 = vld [vmem:[%s4124_s12 + $0xf0] sm:$0xff] }
 0xdd7   :  { %3106 = vmatprep.mubr.msk.f32.mxu0 %vm77_vm0, %v2243_v33  ;;  %v2764_v33 = vld [vmem:[%s4124_s12 + $0xf8] sm:$0xff] }
 0xdd8   :  { %3107 = vmatmul.mubr.msk.f32.vlgmr.msra.gmra.mrb[12].mxu0 %vm77_vm0, %v2250_v30 }
 0xdd9   :  { %3318 = vmatpush3.bf16.msra.mxu0 %v3315_v61 }
 0xdda   :  { %3320 = vmatprep.subr.bf16.mxu0 %v3319_v37 }
 0xddd   :  { %3322 = vmatpush3.bf16.msra.mxu0 %v3319_v37 }
 0xdde   :  { %3324 = vmatprep.subr.bf16.mxu0 %v3323_v1 }
 0xde1   :  { %3326 = vmatpush3.bf16.msra.mxu0 %v3323_v1 }
 0xde2   :  { %3328 = vmatprep.subr.bf16.mxu0 %v3327_v5 }
 0xde5   :  { %3330 = vmatpush3.bf16.msra.mxu0 %v3327_v5  ;;  %v2770_v5 = vld [vmem:[%s4127_s15 + $0x1] ss:$0 sm:$0xff] }
 0xde6   :  { %3332 = vmatprep.subr.bf16.mxu0 %v3331_v9 }
 0xde9   :  { %3334 = vmatpush3.bf16.msra.mxu0 %v3331_v9 }
 0xdea   :  { %3336 = vmatprep.subr.bf16.mxu0 %v3335_v13 }
 0xded   :  { %3338 = vmatpush3.bf16.msra.mxu0 %v3335_v13 }
 0xdee   :  { %3340 = vmatprep.subr.bf16.mxu0 %v3339_v16 }
 0xdf1   :  { %3342 = vmatpush3.bf16.msra.mxu0 %v3339_v16 }
 0xeab   :  { %v3108_v35 = vpop.f32.mrb[12].mxu0 }
 0xeac   :  { %v2336_v36 = vpop.f32.mrb[13].mxu0  ;;  %v2342_v38 = vadd.f32 %v3108_v35, %v2734_v34  ;;  %v2746_v35 = vld [vmem:[%s4123_s11 + $0x1] ss:$0 sm:$0xff] }
 0xead   :  { %v2337_v3 = vadd.f32 %v2734_v34, %v2336_v36  ;;  %v3343_v34 = vpack.c.bf16 %v2764_v33, %v2763_v32 }
 0xeae   :  { %v2346_v42 = vadd.f32 %v2342_v38, %v3872_v62 }
 0xeaf   :  { %v2345_v39 = vadd.f32 %v2337_v3, %v3868_v60  ;;  %3344 = vmatprep.subr.bf16.mxu0 %v3343_v34 }
 0xeb0   :  { %v2354_v43 = vsel %vm77_vm0, %v2346_v42, 0.0  ;;  %3346 = vmatpush3.bf16.msra.mxu0 %v3343_v34 }
 0xeb1   :  { %v2351_v40 = vsel %vm77_vm0, %v2345_v39, 0.0 }
 0xeb2   :  { %2352 = vadd.xlane.f32.xlu1 %v2351_v40 }
 0xeb6   :  { %2355 = vadd.xlane.f32.xlu1 %v2354_v43  ;;  %v2766_v43 = vld [vmem:[%s4125_s13 + $0x1] ss:$0 sm:$0xff] }
 0xf3f   :  { %v2353_v44 = vpop.xlane.xlu1 %2352 }
 0xf40   :  { %v2357_v45 = vmul.f32 0.03125, %v2353_v44 }
 0xf42   :  { %v4002_v46 = vsub.f32 %v2345_v39, %v2357_v45 }
 0xf43   :  { %v2356_v47 = vpop.xlane.xlu1 %2355 }
 0xf44   :  { %v2358_v48 = vmul.f32 0.03125, %v2356_v47  ;;  %v2361_v49 = vmul.f32 %v4002_v46, %v4002_v46 }
 0xf46   :  { %v4006_v50 = vsub.f32 %v2346_v42, %v2358_v48  ;;  %v2363_v60 = vsel %vm77_vm0, %v2361_v49, 0.0 }
 0xf47   :  { %2364 = vadd.xlane.f32.xlu1 %v2363_v60 }
 0xf48   :  { %v2362_v62 = vmul.f32 %v4006_v50, %v4006_v50 }
 0xf4a   :  { %v2366_v51 = vsel %vm77_vm0, %v2362_v62, 0.0 }
 0xf4b   :  { %2367 = vadd.xlane.f32.xlu1 %v2366_v51 }
 0xfd4   :  { %v2365_v17 = vpop.xlane.xlu1 %2364 }
 0xfd5   :  { %v2369_v18 = vmul.f32 0.03125, %v2365_v17 }
 0xfd7   :  { %v2371_v8 = vadd.f32 1e-05, %v2369_v18 }
 0xfd8   :  { %v2368_v11 = vpop.xlane.xlu1 %2367 }
 0xfd9   :  { %3444 = vrsqrt.f32 %v2371_v8  ;;  %v2370_v20 = vmul.f32 0.03125, %v2368_v11 }
 0xfdb   :  { %v2372_v21 = vadd.f32 1e-05, %v2370_v20 }
 0xfdd   :  { %3446 = vrsqrt.f32 %v2372_v21 }
 0xfe3   :  { %v3445_v22 = vpop.eup %3444 }
 0xfe4   :  { %v2375_v23 = vmul.f32 %v3445_v22, %v4002_v46 }
 0xfe6   :  { %v2383_v25 = vmul.f32 %v2739_v27, %v2375_v23 }
 0xfe7   :  { %v3447_v26 = vpop.eup %3446 }
 0xfe8   :  { %v2376_v31 = vmul.f32 %v3447_v26, %v4006_v50  ;;  %v2391_v28 = vadd.f32 %v2740_v24, %v2383_v25 }
 0xfea   :  { %v2384_v29 = vmul.f32 %v2739_v27, %v2376_v31  ;;  %3117 = vmatprep.mubr.msk.f32.mxu1 %vm77_vm0, %v2391_v28 }
 0xfec   :  { %v2392_v30 = vadd.f32 %v2740_v24, %v2384_v29 }
 0xfee   :  { %3118 = vmatmul.mubr.msk.f32.vlgmr.msra.gmra.mrb[30].mxu1 %vm77_vm0, %v2392_v30 }
0x10c1   :  { %v3119_v36 = vpop.f32.mrb[30].mxu1 }
0x10c2   :  { %v2484_v38 = vadd.f32 %v3119_v36, %v2746_v35  ;;  %v2478_v3 = vpop.f32.mrb[31].mxu1 }
0x10c3   :  { %v2479_v39 = vadd.f32 %v2746_v35, %v2478_v3 }
0x10c4   :  { %v2488_v42 = vmax.f32 %v2484_v38, 0.0 }
0x10c5   :  { %v2487_v40 = vmax.f32 %v2479_v39, 0.0 }
0x10c7   :  { %3152 = vmatprep.mubr.f32.mxu0 %v2487_v40 }
0x10c8   :  { %3153 = vmatmul.mubr.f32.vlgmr.msra.gmra.mrb[14].mxu0 %v2488_v42 }
0x119b   :  { %v3154_v44 = vpop.f32.mrb[14].mxu0 }
0x119c   :  { %v2580_v45 = vpop.f32.mrb[15].mxu0  ;;  %v2586_v46 = vadd.f32 %v3154_v44, %v2766_v43 }
0x119d   :  { %v2581_v47 = vadd.f32 %v2766_v43, %v2580_v45 }
0x119e   :  { %v2590_v50 = vadd.f32 %v2586_v46, %v2392_v30 }
0x119f   :  { %v2589_v48 = vadd.f32 %v2581_v47, %v2391_v28 }
0x11a0   :  { %v2598_v60 = vsel %vm77_vm0, %v2590_v50, 0.0 }
0x11a1   :  { %v2595_v49 = vsel %vm77_vm0, %v2589_v48, 0.0 }
0x11a2   :  { %2596 = vadd.xlane.f32.xlu1 %v2595_v49 }
0x11a6   :  { %2599 = vadd.xlane.f32.xlu1 %v2598_v60 }
0x122f   :  { %v2597_v62 = vpop.xlane.xlu1 %2596 }
0x1230   :  { %v2601_v51 = vmul.f32 0.03125, %v2597_v62 }
0x1232   :  { %v2603_v52 = vsub.f32 %v2589_v48, %v2601_v51 }
0x1233   :  { %v2600_v53 = vpop.xlane.xlu1 %2599 }
0x1234   :  { %v2602_v54 = vmul.f32 0.03125, %v2600_v53  ;;  %v2605_v55 = vmul.f32 %v2603_v52, %v2603_v52 }
0x1236   :  { %v2604_v56 = vsub.f32 %v2590_v50, %v2602_v54  ;;  %v2607_v57 = vsel %vm77_vm0, %v2605_v55, 0.0 }
0x1237   :  { %2608 = vadd.xlane.f32.xlu0 %v2607_v57 }
0x1238   :  { %v2606_v58 = vmul.f32 %v2604_v56, %v2604_v56 }
0x123a   :  { %v2610_v41 = vsel %vm77_vm0, %v2606_v58, 0.0 }
0x123b   :  { %2611 = vadd.xlane.f32.xlu1 %v2610_v41 }
0x12c4   :  { %v2609_v59 = vpop.xlane.xlu0 %2608 }
0x12c5   :  { %v2613_v61 = vmul.f32 0.03125, %v2609_v59 }
0x12c7   :  { %v2615_v63 = vadd.f32 1e-05, %v2613_v61 }
0x12c8   :  { %v2612_v37 = vpop.xlane.xlu1 %2611 }
0x12c9   :  { %3448 = vrsqrt.f32 %v2615_v63  ;;  %v2614_v0 = vmul.f32 0.03125, %v2612_v37 }
0x12cb   :  { %v2616_v19 = vadd.f32 1e-05, %v2614_v0 }
0x12cd   :  { %3450 = vrsqrt.f32 %v2616_v19 }
0x12d3   :  { %v3449_v1 = vpop.eup %3448 }
0x12d4   :  { %v2619_v4 = vmul.f32 %v3449_v1, %v2603_v52 }
0x12d6   :  { %v2627_v6 = vmul.f32 %v2769_v2, %v2619_v4 }
0x12d7   :  { %v3451_v7 = vpop.eup %3450 }
0x12d8   :  { %v2620_v9 = vmul.f32 %v3451_v7, %v2604_v56  ;;  %v2635_v10 = vadd.f32 %v2770_v5, %v2627_v6 }
0x12da   :  { %v2628_v12 = vmul.f32 %v2769_v2, %v2620_v9  ;;  %2637 = vst.msk [vmem:[#allocation2] sm:$0xff] %vm77_vm0, %v2635_v10 }
0x12dc   :  { %v2636_v13 = vadd.f32 %v2770_v5, %v2628_v12 }
0x12de   :  { %2638 = vst.msk [vmem:[#allocation2 + $0x8] sm:$0xff] %vm77_vm0, %v2636_v13 }
0x12df   :  { %3467 = shalt.err (!%p3464_p4)
}
0x12e0   :  { %s3468_s5 = scalar_lea.hbm %s4128_s16, 256 }
0x12e1   :  { %p3469_p5 = scmp.ne.s32.totalorder %s4128_s16, %s3468_s5  ;;  %p3472_p6 = scmp.lt.u32.totalorder %s3468_s5, %s4128_s16 }
0x12e3   :  { %p3474_p7 = pnand %p3472_p6, %p3469_p5 }
0x12e5   :  { %3477 = shalt.err (!%p3474_p7)
}
0x12e6   :  { %s3483_s20 = smov 128   ;;  %s3484_s21 = smov 8  }
0x12e7   :  { %2650 = dma.vmem_to_hbm [thread:$0]  %s2645_s4, 256, %s4128_s16, [#allocation3], %s3483_s20, %s3483_s20, %s3484_s21  }
0x12e8   :  { %3478 = dma.done.wait [#allocation3], 256  }
0x12e9   :  { %3479 = vsyncadd [#allocation3], 4294967040 }
0x12ea   :  { %2654 = vsyncpa [#allocation3], 1 }

</bundles_post_ra>
